<compile_context>
chip_gen: v7x
topology: tpu7x:2x2x1
jax: 0.10.0
libtpu: 0.0.40
codegen_flags: <defaults>
</compile_context>

<pallas_src>
import functools

import numpy as np

import jax
import jax.numpy as jnp
from jax.experimental import pallas as pl
from jax.experimental.pallas import tpu as pltpu


# Fixed LeNet geometry implied by fc1 = nn.Linear(256, 120): 28x28 inputs.
_H_IN = 28
_K = 5
_C1, _C2 = 6, 16
_OH1 = _H_IN - _K + 1            # 24  conv1 output H/W
_PH1 = _OH1 // 2                 # 12  pool1 output H/W
_OH2 = _PH1 - _K + 1             # 8   conv2 output H/W
_PH2 = _OH2 // 2                 # 4   pool2 output H/W
_FC1_IN = _C2 * _PH2 * _PH2      # 256
_FC1_OUT, _FC2_OUT = 120, 84
_PAD = 128                       # lane-dense width for FC tensors / outputs
_BIAS_W = 256                    # lane width of the packed bias blob


def _round16(n):
    return ((n + 15) // 16) * 16


def _blob_layouts(batch, cin):
    """Row offsets of each constant inside the two packed bf16 blobs."""
    off144 = {"t1": 0, "pc1": _round16(_K * cin * _H_IN)}
    rows144 = off144["pc1"] + _round16(_C1 * _OH1)

    off128, r = {}, 0
    off128["t2"] = r;  r += _round16(_K * _C1 * _PH1)      # 360 -> 368
    off128["pc2"] = r; r += _round16(_C2 * _OH2)           # 128
    off128["pr1"] = r; r += _round16(2 * batch * _PH1)     # 2B*12
    off128["w1"] = r;  r += _FC1_IN                        # 256
    off128["w2"] = r;  r += _PAD                           # 120 + zero pad
    off128["w3"] = r;  r += _PAD                           # 84 + zero pad
    return off144, rows144, off128, r


# ----------------------------------------------------------------------------
# The fused Pallas kernel
# ----------------------------------------------------------------------------
def _lenet_kernel(x_ref, w144_ref, w128_ref, bias_ref, logits_ref, feat_ref,
                  *, batch, cin, off144, off128, inv_temp):
    dot = functools.partial(jnp.dot, preferred_element_type=jnp.float32)
    bf16 = jnp.bfloat16
    B = batch

    x = x_ref[...]                                            # (B*28, cin*28) f32

    # ---- conv1 + ReLU: ONE MXU dot, contraction over (kh, cin, w) = 140 ----
    # X1'[b*24+oh, i*cin*28 + ci*28 + iw] = x[b, ci, oh+i, iw]
    x1 = jnp.concatenate(
        [jnp.concatenate(
            [x[b * _H_IN + i: b * _H_IN + i + _OH1, :] for i in range(_K)],
            axis=1) for b in range(B)],
        axis=0)                                               # (B*24, 5*cin*28)
    t1 = w144_ref[off144["t1"]: off144["t1"] + _K * cin * _H_IN, :]
    a1 = dot(x1.astype(bf16), t1) + bias_ref[0:1, : _C1 * _OH1]
    a1 = jnp.maximum(a1, 0.0)                                 # (B*24, 144) f32

    # ---- pool1 (2x2): packed even|odd column selector, then row selector ----
    pc1 = w144_ref[off144["pc1"]: off144["pc1"] + _C1 * _OH1, :]
    cb = dot(a1.astype(bf16), pc1)                            # (B*24, 2*72)
    mw = jnp.maximum(cb[:, : _C1 * _PH1], cb[:, _C1 * _PH1: 2 * _C1 * _PH1])
    pr1 = w128_ref[off128["pr1"]: off128["pr1"] + 2 * B * _PH1, : B * _OH1]
    rb = dot(pr1, mw.astype(bf16))                            # (2*B*12, 72)
    p1 = jnp.maximum(rb[: B * _PH1, :], rb[B * _PH1:, :])     # (B*12, 6*12) f32

    # ---- conv2 + ReLU: ONE MXU dot, contraction = kh*C1*W = 360 ----
    x2 = jnp.concatenate(
        [jnp.concatenate(
            [p1[b * _PH1 + i: b * _PH1 + i + _OH2, :] for i in range(_K)],
            axis=1) for b in range(B)],
        axis=0)                                               # (B*8, 360)
    t2 = w128_ref[off128["t2"]: off128["t2"] + _K * _C1 * _PH1, :]
    a2 = dot(x2.astype(bf16), t2) + bias_ref[1:2, : _C2 * _OH2]
    a2 = jnp.maximum(a2, 0.0)                                 # (B*8, 128) f32

    # ---- pool2 columns (packed selector); rows fused into flatten below ----
    pc2 = w128_ref[off128["pc2"]: off128["pc2"] + _C2 * _OH2, :]
    cb2 = dot(a2.astype(bf16), pc2)                           # (B*8, 2*64)
    mw2 = jnp.maximum(cb2[:, : _C2 * _PH2], cb2[:, _C2 * _PH2: 2 * _C2 * _PH2])

    # ---- pool2 rows + NCHW flatten: static sublane slices, no matmuls ----
    rows = []
    for b in range(B):
        pieces = []
        for hh in range(_PH2):
            r0 = b * _OH2 + 2 * hh
            top = mw2[r0: r0 + 1, :]                          # (1, 64)
            bot = mw2[r0 + 1: r0 + 2, :]
            pieces.append(jnp.maximum(top, bot))              # pooled (b, hh)
        rows.append(jnp.concatenate(pieces, axis=1))          # (1, 256)
    xf = jnp.concatenate(rows, axis=0)                        # (B, 256)

    # ---- fc1 / fc2 / fc3 (padded, lane-dense 128-wide weights) ----
    w1 = w128_ref[off128["w1"]: off128["w1"] + _FC1_IN, :]
    h1 = jnp.maximum(dot(xf.astype(bf16), w1) + bias_ref[2:3, :_PAD], 0.0)
    w2 = w128_ref[off128["w2"]: off128["w2"] + _PAD, :]
    feat = jnp.maximum(dot(h1.astype(bf16), w2) + bias_ref[3:4, :_PAD], 0.0)
    feat_ref[...] = feat
    w3 = w128_ref[off128["w3"]: off128["w3"] + _PAD, :]
    logits_ref[...] = (dot(feat.astype(bf16), w3) + bias_ref[4:5, :_PAD]) * inv_temp


# ----------------------------------------------------------------------------
# One-time parameter / selector preparation (off the hot path)
# ----------------------------------------------------------------------------
def prepare_lenet(params, batch, num_classes):
    """Packs all kernel constants into 3 lane-dense bf16/f32 blobs."""
    assert num_classes <= _PAD
    B = batch
    cin = params["conv1_w"].shape[1]
    off144, rows144, off128, rows128 = _blob_layouts(B, cin)
    f32 = np.float32

    def toeplitz_stacked(w, w_in):
        # T[(i, ci, iw), (co, ow)] = w[co, ci, i, iw - ow]   (valid conv)
        w = np.asarray(w, f32)
        cout, cin_, kh, kw = w.shape
        ow_ = w_in - kw + 1
        t = np.zeros((kh, cin_, w_in, cout, ow_), f32)
        for i in range(kh):
            for j in range(kw):
                for o in range(ow_):
                    t[i, :, o + j, :, o] = w[:, :, i, j].T
        return t.reshape(kh * cin_ * w_in, cout * ow_)

    def colpool_packed(c, w_in):
        # even input columns -> left output half, odd -> right half.
        w_out = w_in // 2
        p = np.zeros((c * w_in, 2 * c * w_out), f32)
        for ch in range(c):
            for pw in range(w_out):
                p[ch * w_in + 2 * pw, ch * w_out + pw] = 1.0
                p[ch * w_in + 2 * pw + 1, c * w_out + ch * w_out + pw] = 1.0
        return p

    def rowpool_packed(h_in):
        # even rows (per batch) -> top half of output, odd rows -> bottom half.
        h_out = h_in // 2
        p = np.zeros((2 * B * h_out, B * h_in), f32)
        for b in range(B):
            for ph in range(h_out):
                p[b * h_out + ph, b * h_in + 2 * ph] = 1.0
                p[B * h_out + b * h_out + ph, b * h_in + 2 * ph + 1] = 1.0
        return p

    # ---- 144-lane blob: conv1 stacked Toeplitz + pool1 column selector ----
    w144 = np.zeros((rows144, _C1 * _OH1), f32)
    t1 = toeplitz_stacked(params["conv1_w"], _H_IN)
    w144[off144["t1"]: off144["t1"] + t1.shape[0], :] = t1
    pc1 = colpool_packed(_C1, _OH1)
    w144[off144["pc1"]: off144["pc1"] + pc1.shape[0], :] = pc1

    # ---- 128-lane blob: conv2 Toeplitz, pool selectors, fc weights ----
    w128 = np.zeros((rows128, _PAD), f32)
    t2 = toeplitz_stacked(params["conv2_w"], _PH1)
    w128[off128["t2"]: off128["t2"] + t2.shape[0], :] = t2
    pc2 = colpool_packed(_C2, _OH2)
    w128[off128["pc2"]: off128["pc2"] + pc2.shape[0], :] = pc2
    pr1 = rowpool_packed(_OH1)
    w128[off128["pr1"]: off128["pr1"] + pr1.shape[0], : pr1.shape[1]] = pr1

    # fc1: fold the PyTorch NCHW flatten order (c, h, w) into our (h, c, w).
    w1 = np.asarray(params["fc1_w"], f32).reshape(_FC1_OUT, _C2, _PH2, _PH2)
    w1 = np.transpose(w1, (2, 1, 3, 0)).reshape(_FC1_IN, _FC1_OUT)
    w128[off128["w1"]: off128["w1"] + _FC1_IN, : _FC1_OUT] = w1
    w128[off128["w2"]: off128["w2"] + _FC1_OUT, : _FC2_OUT] = np.asarray(
        params["fc2_w"], f32).T
    w128[off128["w3"]: off128["w3"] + _FC2_OUT, : num_classes] = np.asarray(
        params["fc3_w"], f32).T

    # ---- packed bias blob (kept f32: added after the f32 accumulation) ----
    bias = np.zeros((5, _BIAS_W), f32)
    bias[0, : _C1 * _OH1] = np.repeat(np.asarray(params["conv1_b"], f32), _OH1)
    bias[1, : _C2 * _OH2] = np.repeat(np.asarray(params["conv2_b"], f32), _OH2)
    bias[2, : _FC1_OUT] = np.asarray(params["fc1_b"], f32)
    bias[3, : _FC2_OUT] = np.asarray(params["fc2_b"], f32)
    bias[4, : num_classes] = np.asarray(params["fc3_b"], f32)

    return {
        "w144": jnp.asarray(w144, jnp.bfloat16),
        "w128": jnp.asarray(w128, jnp.bfloat16),
        "bias": jnp.asarray(bias),
    }


# ----------------------------------------------------------------------------
# Forward pass (one gridless pallas_call, everything resident in VMEM)
# ----------------------------------------------------------------------------
def lenet_forward(prepped, x_nchw, *, num_classes, temp=1.0):
    """x_nchw: (B, Cin, 28, 28) float32.  Returns (logits, feature)."""
    bsz, cin, h, w = x_nchw.shape
    assert h == _H_IN and w == _H_IN
    off144, _, off128, _ = _blob_layouts(bsz, cin)

    # (B, Cin, H, W) -> batch-major wide layout (B*H, Cin*W).
    x_wide = jnp.transpose(x_nchw, (0, 2, 1, 3)).reshape(
        bsz * _H_IN, cin * _H_IN).astype(jnp.float32)

    vmem = functools.partial(pl.BlockSpec, memory_space=pltpu.MemorySpace.VMEM)
    kernel = functools.partial(_lenet_kernel, batch=bsz, cin=cin,
                               off144=off144, off128=off128,
                               inv_temp=1.0 / float(temp))
    logits_pad, feat_pad = pl.pallas_call(
        kernel,
        out_shape=(jax.ShapeDtypeStruct((bsz, _PAD), jnp.float32),
                   jax.ShapeDtypeStruct((bsz, _PAD), jnp.float32)),
        in_specs=[vmem(), vmem(), vmem(), vmem()],
        out_specs=(vmem(), vmem()),
    )(x_wide, prepped["w144"], prepped["w128"], prepped["bias"])

    return logits_pad[:, :num_classes], feat_pad[:, :_FC2_OUT]


# ----------------------------------------------------------------------------
# Parameter init (PyTorch-style uniform +-1/sqrt(fan_in)) and a JAX reference
# ----------------------------------------------------------------------------
def init_lenet_params(key, num_classes, mnist=True):
    in_ch = 1 if mnist else 3
    shapes = {
        "conv1_w": (6, in_ch, 5, 5), "conv1_b": (6,),
        "conv2_w": (16, 6, 5, 5),    "conv2_b": (16,),
        "fc1_w": (120, 256),         "fc1_b": (120,),
        "fc2_w": (84, 120),          "fc2_b": (84,),
        "fc3_w": (num_classes, 84),  "fc3_b": (num_classes,),
    }
    fan_in = {
        "conv1": in_ch * 25, "conv2": 6 * 25,
        "fc1": 256, "fc2": 120, "fc3": 84,
    }
    params = {}
    keys = jax.random.split(key, len(shapes))
    for k, (name, shape) in zip(keys, shapes.items()):
        bound = 1.0 / jnp.sqrt(float(fan_in[name.split("_")[0]]))
        params[name] = jax.random.uniform(
            k, shape, jnp.float32, minval=-bound, maxval=bound)
    return params


def lenet_reference(params, x, temp=1.0):
    """Plain-JAX (XLA) reference with identical semantics, for validation."""
    def conv(z, w, b):
        y = jax.lax.conv_general_dilated(
            z, w, window_strides=(1, 1), padding="VALID",
            dimension_numbers=("NCHW", "OIHW", "NCHW"))
        return y + b[None, :, None, None]

    h = jax.nn.relu(conv(x, params["conv1_w"], params["conv1_b"]))
    h = jax.lax.reduce_window(h, -jnp.inf, jax.lax.max,
                              (1, 1, 2, 2), (1, 1, 2, 2), "VALID")
    h = jax.nn.relu(conv(h, params["conv2_w"], params["conv2_b"]))
    h = jax.lax.reduce_window(h, -jnp.inf, jax.lax.max,
                              (1, 1, 2, 2), (1, 1, 2, 2), "VALID")
    h = h.reshape(h.shape[0], -1)
    h = jax.nn.relu(h @ params["fc1_w"].T + params["fc1_b"])
    feat = jax.nn.relu(h @ params["fc2_w"].T + params["fc2_b"])
    logits = (feat @ params["fc3_w"].T + params["fc3_b"]) / temp
    return logits, feat


# ----------------------------------------------------------------------------
if __name__ == "__main__":
    num_classes = 10
    batch = 2
    temp = 1.0

    key = jax.random.PRNGKey(0)
    k_params, k_x = jax.random.split(key)

    params = init_lenet_params(k_params, num_classes, mnist=True)
    # MNIST-shaped input (fc1 in_features=256 implies 28x28, single channel).
    x = jax.random.normal(k_x, (batch, 1, 28, 28), dtype=jnp.float32)

    # One-time layout prep (stacked Toeplitz, packed selectors, padded FC
    # weights, bias blob) -- not on the per-forward hot path.
    prepped = prepare_lenet(params, batch, num_classes)

    fwd = jax.jit(functools.partial(lenet_forward,
                                    num_classes=num_classes, temp=temp))
    logits, feature = fwd(prepped, x)
    jax.block_until_ready((logits, feature))

    assert logits.shape == (batch, num_classes)
    assert feature.shape == (batch, 84)

    # Sanity check vs. the plain-JAX f32 reference.  Tolerance accounts for
    # the bf16 weight/activation casts on the MXU path.
    ref_logits, ref_feat = lenet_reference(params, x, temp)
    assert jnp.allclose(logits, ref_logits, rtol=4e-2, atol=4e-2), "logits mismatch"
    assert jnp.allclose(feature, ref_feat, rtol=4e-2, atol=4e-2), "feature mismatch"

    print("KERNEL_OK")
</pallas_src>

<mosaic_0001>
module attributes {stable_mosaic.version = 11 : i64} {
  func.func @_lenet_kernel(%arg0: memref<56x28xf32, #tpu.memory_space<vmem>>, %arg1: memref<288x144xbf16, #tpu.memory_space<vmem>>, %arg2: memref<1056x128xbf16, #tpu.memory_space<vmem>>, %arg3: memref<5x256xf32, #tpu.memory_space<vmem>>, %arg4: memref<2x128xf32, #tpu.memory_space<vmem>>, %arg5: memref<2x128xf32, #tpu.memory_space<vmem>>) attributes {dimension_semantics = [], scalar_prefetch = 0 : i64, scratch_operands = 0 : i64, tpu.core_type = #tpu.core_type<tc>} {
    %c0 = arith.constant 0 : index
    %c0_0 = arith.constant 0 : index
    %0 = vector.load %arg0[%c0, %c0_0] : memref<56x28xf32, #tpu.memory_space<vmem>>, vector<56x28xf32>
    %1 = vector.extract_strided_slice %0 {offsets = [0, 0], sizes = [24, 28], strides = [1, 1]} : vector<56x28xf32> to vector<24x28xf32>
    %2 = vector.extract_strided_slice %0 {offsets = [1, 0], sizes = [24, 28], strides = [1, 1]} : vector<56x28xf32> to vector<24x28xf32>
    %3 = vector.extract_strided_slice %0 {offsets = [2, 0], sizes = [24, 28], strides = [1, 1]} : vector<56x28xf32> to vector<24x28xf32>
    %4 = vector.extract_strided_slice %0 {offsets = [3, 0], sizes = [24, 28], strides = [1, 1]} : vector<56x28xf32> to vector<24x28xf32>
    %5 = vector.extract_strided_slice %0 {offsets = [4, 0], sizes = [24, 28], strides = [1, 1]} : vector<56x28xf32> to vector<24x28xf32>
    %6 = tpu.concatenate %1, %2, %3, %4, %5 in 1 : vector<24x28xf32>, vector<24x28xf32>, vector<24x28xf32>, vector<24x28xf32>, vector<24x28xf32> -> vector<24x140xf32>
    %7 = vector.extract_strided_slice %0 {offsets = [28, 0], sizes = [24, 28], strides = [1, 1]} : vector<56x28xf32> to vector<24x28xf32>
    %8 = vector.extract_strided_slice %0 {offsets = [29, 0], sizes = [24, 28], strides = [1, 1]} : vector<56x28xf32> to vector<24x28xf32>
    %9 = vector.extract_strided_slice %0 {offsets = [30, 0], sizes = [24, 28], strides = [1, 1]} : vector<56x28xf32> to vector<24x28xf32>
    %10 = vector.extract_strided_slice %0 {offsets = [31, 0], sizes = [24, 28], strides = [1, 1]} : vector<56x28xf32> to vector<24x28xf32>
    %11 = vector.extract_strided_slice %0 {offsets = [32, 0], sizes = [24, 28], strides = [1, 1]} : vector<56x28xf32> to vector<24x28xf32>
    %12 = tpu.concatenate %7, %8, %9, %10, %11 in 1 : vector<24x28xf32>, vector<24x28xf32>, vector<24x28xf32>, vector<24x28xf32>, vector<24x28xf32> -> vector<24x140xf32>
    %13 = tpu.concatenate %6, %12 in 0 : vector<24x140xf32>, vector<24x140xf32> -> vector<48x140xf32>
    %c0_1 = arith.constant 0 : index
    %c0_2 = arith.constant 0 : index
    %14 = vector.load %arg1[%c0_1, %c0_2] : memref<288x144xbf16, #tpu.memory_space<vmem>>, vector<140x144xbf16>
    %15 = arith.truncf %13 : vector<48x140xf32> to vector<48x140xbf16>
    %cst = arith.constant dense<0.000000e+00> : vector<48x144xf32>
    %16 = tpu.matmul %15, %14, %cst {dimension_numbers = #tpu.dot_dimension_numbers<[1], [0], [0], [1], [0, 0, 1, 1], [], []>} : vector<48x140xbf16>, vector<140x144xbf16>, vector<48x144xf32> -> vector<48x144xf32>
    %c0_3 = arith.constant 0 : index
    %c0_4 = arith.constant 0 : index
    %17 = vector.load %arg3[%c0_3, %c0_4] : memref<5x256xf32, #tpu.memory_space<vmem>>, vector<1x144xf32>
    %18 = vector.broadcast %17 : vector<1x144xf32> to vector<48x144xf32>
    %19 = arith.addf %16, %18 : vector<48x144xf32>
    %cst_5 = arith.constant 0.000000e+00 : f32
    %20 = vector.broadcast %cst_5 : f32 to vector<48x144xf32>
    %21 = arith.maximumf %19, %20 : vector<48x144xf32>
    %c144 = arith.constant 144 : index
    %c0_6 = arith.constant 0 : index
    %22 = vector.load %arg1[%c144, %c0_6] : memref<288x144xbf16, #tpu.memory_space<vmem>>, vector<144x144xbf16>
    %23 = arith.truncf %21 : vector<48x144xf32> to vector<48x144xbf16>
    %cst_7 = arith.constant dense<0.000000e+00> : vector<48x144xf32>
    %24 = tpu.matmul %23, %22, %cst_7 {dimension_numbers = #tpu.dot_dimension_numbers<[1], [0], [0], [1], [0, 0, 1, 1], [], []>} : vector<48x144xbf16>, vector<144x144xbf16>, vector<48x144xf32> -> vector<48x144xf32>
    %25 = vector.extract_strided_slice %24 {offsets = [0, 0], sizes = [48, 72], strides = [1, 1]} : vector<48x144xf32> to vector<48x72xf32>
    %26 = vector.extract_strided_slice %24 {offsets = [0, 72], sizes = [48, 72], strides = [1, 1]} : vector<48x144xf32> to vector<48x72xf32>
    %27 = arith.maximumf %25, %26 : vector<48x72xf32>
    %c496 = arith.constant 496 : index
    %c0_8 = arith.constant 0 : index
    %28 = vector.load %arg2[%c496, %c0_8] : memref<1056x128xbf16, #tpu.memory_space<vmem>>, vector<48x48xbf16>
    %29 = arith.truncf %27 : vector<48x72xf32> to vector<48x72xbf16>
    %cst_9 = arith.constant dense<0.000000e+00> : vector<48x72xf32>
    %30 = tpu.matmul %28, %29, %cst_9 {dimension_numbers = #tpu.dot_dimension_numbers<[1], [0], [0], [1], [0, 0, 1, 1], [], []>} : vector<48x48xbf16>, vector<48x72xbf16>, vector<48x72xf32> -> vector<48x72xf32>
    %31 = vector.extract_strided_slice %30 {offsets = [0, 0], sizes = [24, 72], strides = [1, 1]} : vector<48x72xf32> to vector<24x72xf32>
    %32 = vector.extract_strided_slice %30 {offsets = [24, 0], sizes = [24, 72], strides = [1, 1]} : vector<48x72xf32> to vector<24x72xf32>
    %33 = arith.maximumf %31, %32 : vector<24x72xf32>
    %34 = vector.extract_strided_slice %33 {offsets = [0, 0], sizes = [8, 72], strides = [1, 1]} : vector<24x72xf32> to vector<8x72xf32>
    %35 = vector.extract_strided_slice %33 {offsets = [1, 0], sizes = [8, 72], strides = [1, 1]} : vector<24x72xf32> to vector<8x72xf32>
    %36 = vector.extract_strided_slice %33 {offsets = [2, 0], sizes = [8, 72], strides = [1, 1]} : vector<24x72xf32> to vector<8x72xf32>
    %37 = vector.extract_strided_slice %33 {offsets = [3, 0], sizes = [8, 72], strides = [1, 1]} : vector<24x72xf32> to vector<8x72xf32>
    %38 = vector.extract_strided_slice %33 {offsets = [4, 0], sizes = [8, 72], strides = [1, 1]} : vector<24x72xf32> to vector<8x72xf32>
    %39 = tpu.concatenate %34, %35, %36, %37, %38 in 1 : vector<8x72xf32>, vector<8x72xf32>, vector<8x72xf32>, vector<8x72xf32>, vector<8x72xf32> -> vector<8x360xf32>
    %40 = vector.extract_strided_slice %33 {offsets = [12, 0], sizes = [8, 72], strides = [1, 1]} : vector<24x72xf32> to vector<8x72xf32>
    %41 = vector.extract_strided_slice %33 {offsets = [13, 0], sizes = [8, 72], strides = [1, 1]} : vector<24x72xf32> to vector<8x72xf32>
    %42 = vector.extract_strided_slice %33 {offsets = [14, 0], sizes = [8, 72], strides = [1, 1]} : vector<24x72xf32> to vector<8x72xf32>
    %43 = vector.extract_strided_slice %33 {offsets = [15, 0], sizes = [8, 72], strides = [1, 1]} : vector<24x72xf32> to vector<8x72xf32>
    %44 = vector.extract_strided_slice %33 {offsets = [16, 0], sizes = [8, 72], strides = [1, 1]} : vector<24x72xf32> to vector<8x72xf32>
    %45 = tpu.concatenate %40, %41, %42, %43, %44 in 1 : vector<8x72xf32>, vector<8x72xf32>, vector<8x72xf32>, vector<8x72xf32>, vector<8x72xf32> -> vector<8x360xf32>
    %46 = tpu.concatenate %39, %45 in 0 : vector<8x360xf32>, vector<8x360xf32> -> vector<16x360xf32>
    %c0_10 = arith.constant 0 : index
    %c0_11 = arith.constant 0 : index
    %47 = vector.load %arg2[%c0_10, %c0_11] : memref<1056x128xbf16, #tpu.memory_space<vmem>>, vector<360x128xbf16>
    %48 = arith.truncf %46 : vector<16x360xf32> to vector<16x360xbf16>
    %cst_12 = arith.constant dense<0.000000e+00> : vector<16x128xf32>
    %49 = tpu.matmul %48, %47, %cst_12 {dimension_numbers = #tpu.dot_dimension_numbers<[1], [0], [0], [1], [0, 0, 1, 1], [], []>} : vector<16x360xbf16>, vector<360x128xbf16>, vector<16x128xf32> -> vector<16x128xf32>
    %c1 = arith.constant 1 : index
    %c0_13 = arith.constant 0 : index
    %50 = vector.load %arg3[%c1, %c0_13] : memref<5x256xf32, #tpu.memory_space<vmem>>, vector<1x128xf32>
    %51 = vector.broadcast %50 : vector<1x128xf32> to vector<16x128xf32>
    %52 = arith.addf %49, %51 : vector<16x128xf32>
    %cst_14 = arith.constant 0.000000e+00 : f32
    %53 = vector.broadcast %cst_14 : f32 to vector<16x128xf32>
    %54 = arith.maximumf %52, %53 : vector<16x128xf32>
    %c368 = arith.constant 368 : index
    %c0_15 = arith.constant 0 : index
    %55 = vector.load %arg2[%c368, %c0_15] : memref<1056x128xbf16, #tpu.memory_space<vmem>>, vector<128x128xbf16>
    %56 = arith.truncf %54 : vector<16x128xf32> to vector<16x128xbf16>
    %cst_16 = arith.constant dense<0.000000e+00> : vector<16x128xf32>
    %57 = tpu.matmul %56, %55, %cst_16 {dimension_numbers = #tpu.dot_dimension_numbers<[1], [0], [0], [1], [0, 0, 1, 1], [], []>} : vector<16x128xbf16>, vector<128x128xbf16>, vector<16x128xf32> -> vector<16x128xf32>
    %58 = vector.extract_strided_slice %57 {offsets = [0, 0], sizes = [16, 64], strides = [1, 1]} : vector<16x128xf32> to vector<16x64xf32>
    %59 = vector.extract_strided_slice %57 {offsets = [0, 64], sizes = [16, 64], strides = [1, 1]} : vector<16x128xf32> to vector<16x64xf32>
    %60 = arith.maximumf %58, %59 : vector<16x64xf32>
    %61 = vector.extract_strided_slice %60 {offsets = [0, 0], sizes = [1, 64], strides = [1, 1]} : vector<16x64xf32> to vector<1x64xf32>
    %62 = vector.extract_strided_slice %60 {offsets = [1, 0], sizes = [1, 64], strides = [1, 1]} : vector<16x64xf32> to vector<1x64xf32>
    %63 = arith.maximumf %61, %62 : vector<1x64xf32>
    %64 = vector.extract_strided_slice %60 {offsets = [2, 0], sizes = [1, 64], strides = [1, 1]} : vector<16x64xf32> to vector<1x64xf32>
    %65 = vector.extract_strided_slice %60 {offsets = [3, 0], sizes = [1, 64], strides = [1, 1]} : vector<16x64xf32> to vector<1x64xf32>
    %66 = arith.maximumf %64, %65 : vector<1x64xf32>
    %67 = vector.extract_strided_slice %60 {offsets = [4, 0], sizes = [1, 64], strides = [1, 1]} : vector<16x64xf32> to vector<1x64xf32>
    %68 = vector.extract_strided_slice %60 {offsets = [5, 0], sizes = [1, 64], strides = [1, 1]} : vector<16x64xf32> to vector<1x64xf32>
    %69 = arith.maximumf %67, %68 : vector<1x64xf32>
    %70 = vector.extract_strided_slice %60 {offsets = [6, 0], sizes = [1, 64], strides = [1, 1]} : vector<16x64xf32> to vector<1x64xf32>
    %71 = vector.extract_strided_slice %60 {offsets = [7, 0], sizes = [1, 64], strides = [1, 1]} : vector<16x64xf32> to vector<1x64xf32>
    %72 = arith.maximumf %70, %71 : vector<1x64xf32>
    %73 = tpu.concatenate %63, %66, %69, %72 in 1 : vector<1x64xf32>, vector<1x64xf32>, vector<1x64xf32>, vector<1x64xf32> -> vector<1x256xf32>
    %74 = vector.extract_strided_slice %60 {offsets = [8, 0], sizes = [1, 64], strides = [1, 1]} : vector<16x64xf32> to vector<1x64xf32>
    %75 = vector.extract_strided_slice %60 {offsets = [9, 0], sizes = [1, 64], strides = [1, 1]} : vector<16x64xf32> to vector<1x64xf32>
    %76 = arith.maximumf %74, %75 : vector<1x64xf32>
    %77 = vector.extract_strided_slice %60 {offsets = [10, 0], sizes = [1, 64], strides = [1, 1]} : vector<16x64xf32> to vector<1x64xf32>
    %78 = vector.extract_strided_slice %60 {offsets = [11, 0], sizes = [1, 64], strides = [1, 1]} : vector<16x64xf32> to vector<1x64xf32>
    %79 = arith.maximumf %77, %78 : vector<1x64xf32>
    %80 = vector.extract_strided_slice %60 {offsets = [12, 0], sizes = [1, 64], strides = [1, 1]} : vector<16x64xf32> to vector<1x64xf32>
    %81 = vector.extract_strided_slice %60 {offsets = [13, 0], sizes = [1, 64], strides = [1, 1]} : vector<16x64xf32> to vector<1x64xf32>
    %82 = arith.maximumf %80, %81 : vector<1x64xf32>
    %83 = vector.extract_strided_slice %60 {offsets = [14, 0], sizes = [1, 64], strides = [1, 1]} : vector<16x64xf32> to vector<1x64xf32>
    %84 = vector.extract_strided_slice %60 {offsets = [15, 0], sizes = [1, 64], strides = [1, 1]} : vector<16x64xf32> to vector<1x64xf32>
    %85 = arith.maximumf %83, %84 : vector<1x64xf32>
    %86 = tpu.concatenate %76, %79, %82, %85 in 1 : vector<1x64xf32>, vector<1x64xf32>, vector<1x64xf32>, vector<1x64xf32> -> vector<1x256xf32>
    %87 = tpu.concatenate %73, %86 in 0 : vector<1x256xf32>, vector<1x256xf32> -> vector<2x256xf32>
    %c544 = arith.constant 544 : index
    %c0_17 = arith.constant 0 : index
    %88 = vector.load %arg2[%c544, %c0_17] : memref<1056x128xbf16, #tpu.memory_space<vmem>>, vector<256x128xbf16>
    %89 = arith.truncf %87 : vector<2x256xf32> to vector<2x256xbf16>
    %cst_18 = arith.constant dense<0.000000e+00> : vector<2x128xf32>
    %90 = tpu.matmul %89, %88, %cst_18 {dimension_numbers = #tpu.dot_dimension_numbers<[1], [0], [0], [1], [0, 0, 1, 1], [], []>} : vector<2x256xbf16>, vector<256x128xbf16>, vector<2x128xf32> -> vector<2x128xf32>
    %c2 = arith.constant 2 : index
    %c0_19 = arith.constant 0 : index
    %91 = vector.load %arg3[%c2, %c0_19] : memref<5x256xf32, #tpu.memory_space<vmem>>, vector<1x128xf32>
    %92 = vector.broadcast %91 : vector<1x128xf32> to vector<2x128xf32>
    %93 = arith.addf %90, %92 : vector<2x128xf32>
    %cst_20 = arith.constant 0.000000e+00 : f32
    %94 = vector.broadcast %cst_20 : f32 to vector<2x128xf32>
    %95 = arith.maximumf %93, %94 : vector<2x128xf32>
    %c800 = arith.constant 800 : index
    %c0_21 = arith.constant 0 : index
    %96 = vector.load %arg2[%c800, %c0_21] : memref<1056x128xbf16, #tpu.memory_space<vmem>>, vector<128x128xbf16>
    %97 = arith.truncf %95 : vector<2x128xf32> to vector<2x128xbf16>
    %cst_22 = arith.constant dense<0.000000e+00> : vector<2x128xf32>
    %98 = tpu.matmul %97, %96, %cst_22 {dimension_numbers = #tpu.dot_dimension_numbers<[1], [0], [0], [1], [0, 0, 1, 1], [], []>} : vector<2x128xbf16>, vector<128x128xbf16>, vector<2x128xf32> -> vector<2x128xf32>
    %c3 = arith.constant 3 : index
    %c0_23 = arith.constant 0 : index
    %99 = vector.load %arg3[%c3, %c0_23] : memref<5x256xf32, #tpu.memory_space<vmem>>, vector<1x128xf32>
    %100 = vector.broadcast %99 : vector<1x128xf32> to vector<2x128xf32>
    %101 = arith.addf %98, %100 : vector<2x128xf32>
    %cst_24 = arith.constant 0.000000e+00 : f32
    %102 = vector.broadcast %cst_24 : f32 to vector<2x128xf32>
    %103 = arith.maximumf %101, %102 : vector<2x128xf32>
    %c0_25 = arith.constant 0 : index
    %c0_26 = arith.constant 0 : index
    %104 = vector.load %arg5[%c0_25, %c0_26] : memref<2x128xf32, #tpu.memory_space<vmem>>, vector<2x128xf32>
    tpu.vector_store %arg5[%c0_25, %c0_26], %103 {strides = array<i32>} : memref<2x128xf32, #tpu.memory_space<vmem>>, vector<2x128xf32>,
    %c928 = arith.constant 928 : index
    %c0_27 = arith.constant 0 : index
    %105 = vector.load %arg2[%c928, %c0_27] : memref<1056x128xbf16, #tpu.memory_space<vmem>>, vector<128x128xbf16>
    %106 = arith.truncf %103 : vector<2x128xf32> to vector<2x128xbf16>
    %cst_28 = arith.constant dense<0.000000e+00> : vector<2x128xf32>
    %107 = tpu.matmul %106, %105, %cst_28 {dimension_numbers = #tpu.dot_dimension_numbers<[1], [0], [0], [1], [0, 0, 1, 1], [], []>} : vector<2x128xbf16>, vector<128x128xbf16>, vector<2x128xf32> -> vector<2x128xf32>
    %c4 = arith.constant 4 : index
    %c0_29 = arith.constant 0 : index
    %108 = vector.load %arg3[%c4, %c0_29] : memref<5x256xf32, #tpu.memory_space<vmem>>, vector<1x128xf32>
    %109 = vector.broadcast %108 : vector<1x128xf32> to vector<2x128xf32>
    %110 = arith.addf %107, %109 : vector<2x128xf32>
    %cst_30 = arith.constant 1.000000e+00 : f32
    %111 = vector.broadcast %cst_30 : f32 to vector<2x128xf32>
    %112 = arith.mulf %110, %111 : vector<2x128xf32>
    %c0_31 = arith.constant 0 : index
    %c0_32 = arith.constant 0 : index
    %113 = vector.load %arg4[%c0_31, %c0_32] : memref<2x128xf32, #tpu.memory_space<vmem>>, vector<2x128xf32>
    tpu.vector_store %arg4[%c0_31, %c0_32], %112 {strides = array<i32>} : memref<2x128xf32, #tpu.memory_space<vmem>>, vector<2x128xf32>,
    return
  }
}

</mosaic_0001>

<bundles_post_ra>
// kernel: lenet_forward.1
= control target key start
LH: loop header
LB: loop body
LE: loop exit
PB: predicated region body
PF: predicated region fallthrough
CT: control target
= control target key end

     0   :  { %11 = vsyncpa [#allocation3], 0  ;;  %s2817_s0 = inlined_call_operand.vmem [shape: f32[56,28], index: 0, kind: input, shape index: {}]   ;;  %s2818_s1 = inlined_call_operand.vmem [shape: bf16[288,144], index: 1, kind: input, shape index: {}]   ;;  %s2819_s2 = inlined_call_operand.hbm [shape: bf16[1056,128], index: 2, kind: input, shape index: {}]   ;;  %s2820_s3 = inlined_call_operand.vmem [shape: f32[5,256], index: 3, kind: input, shape index: {}]   ;;  %s2821_s4 = inlined_call_operand.hbm [shape: f32[2,128], index: 4, kind: output, shape index: {0}]   ;;  %s2822_s5 = inlined_call_operand.hbm [shape: f32[2,128], index: 5, kind: output, shape index: {1}]  }
   0x1   :  { %12 = vsyncpa [#allocation4], 0 }
   0x2   :  { %13 = vsyncpa [#allocation7], 0  ;;  %s2350_s18 = smov [#allocation2]   ;;  %s2278_s22 = scalar_lea.hbm %s2819_s2, 8448 }
   0x3   :  { %s23_s19 = sshll.u32 %s2350_s18, 4  ;;  %p2279_p0 = scmp.ne.s32.totalorder %s2819_s2, %s2278_s22  ;;  %s24_s19 = int_to_ptr.vmem [resolvable:$true] %s23_s19 }
   0x4   :  { %p2282_p1 = scmp.lt.u32.totalorder %s2278_s22, %s2819_s2 }
   0x6   :  { %p2284_p2 = pnand %p2282_p1, %p2279_p0 }
   0x8   :  { %2287 = shalt.err (!%p2284_p2)
}
   0x9   :  { %s2288_s27 = scalar_lea.vmem %s24_s19, 8448  ;;  %p2293_p4 = scmp.lt.s32.totalorder %s24_s19, %s24_s19 }
   0xa   :  { %p2289_p3 = scmp.ne.s32.totalorder %s24_s19, %s2288_s27  ;;  %p2294_p5 = scmp.lt.s32.totalorder %s2288_s27, %s2288_s27 }
   0xc   :  { %p2295_p6 = por %p2294_p5, %p2293_p4 }
   0xe   :  { %p2296_p7 = pnand %p2295_p6, %p2289_p3 }
  0x10   :  { %2299 = shalt.err (!%p2296_p7)
}
  0x11   :  { %s2351_s28 = smov 64   ;;  %s2352_s29 = smov 4  }
  0x12   :  { %29 = dma.hbm_to_vmem [thread:$0]  %s2819_s2, 8448, %s24_s19, [#allocation3], %s2351_s28, %s2351_s28, %s2352_s29  }
  0x13   :  { %2344 = dma.done.wait [#allocation3], 8448  }
  0x14   :  { %2345 = vsyncadd [#allocation3], 4294958848  ;;  %vm81_vm0 = vcmask 1044480   ;;  %v2412_v0 = vld [vmem:[%s2817_s0] sm:$0xff]  ;;  %v2417_v1 = vld [vmem:[%s2817_s0 + $0x8] sm:$0xff]  ;;  %vm47_vm1 = vcmask 1046528  }
  0x15   :  { %v2422_v2 = vld [vmem:[%s2817_s0 + $0x10] sm:$0xff]  ;;  %vm98_vm2 = vcmask 1043456   ;;  %vm64_vm3 = vcmask 1045504   ;;  %v82_v3 = vrot.slane %v2412_v0, 3  ;;  %v83_v4 = vrot.slane %v2417_v1, 3  ;;  %v2431_v7 = vld [vmem:[%s2817_s0 + $0x18] sm:$0xff] }
  0x16   :  { %v85_v5 = vrot.slane %v2422_v2, 3  ;;  %v48_v6 = vrot.slane %v2412_v0, 1  ;;  %v49_v8 = vrot.slane %v2417_v1, 1  ;;  %v51_v9 = vrot.slane %v2422_v2, 1  ;;  %v2440_v12 = vld [vmem:[%s2817_s0 + $0x20] sm:$0xff]  ;;  %v2445_v13 = vld [vmem:[%s2817_s0 + $0x28] sm:$0xff] }
  0x17   :  { %v99_v10 = vrot.slane %v2412_v0, 4  ;;  %v100_v11 = vrot.slane %v2417_v1, 4  ;;  %v84_v14 = vsel %vm81_vm0, %v82_v3, %v83_v4  ;;  %v102_v16 = vrot.slane %v2422_v2, 4  ;;  %v2158_v18 = vld [vmem:[%s2818_s1 + $0x4] ss:$8 sps:$4 sm:$0xff]   ;;  %v2462_v23 = vld [vmem:[%s2817_s0 + $0x30] sm:$0xff] }
  0x18   :  { %v86_v15 = vsel %vm81_vm0, %v83_v4, %v85_v5  ;;  %v65_v17 = vrot.slane %v2412_v0, 2  ;;  %v50_v20 = vsel %vm47_vm1, %v48_v6, %v49_v8  ;;  %v52_v21 = vsel %vm47_vm1, %v49_v8, %v51_v9  ;;  %v2160_v24 = vld [vmem:[%s2818_s1] ss:$8 sps:$4 sm:$0xff]   ;;  %385 = vmatprep.subr.bf16.mxu0 %v2158_v18  ;;  %v2161_v29 = vld [vmem:[%s2818_s1 + $0x14] ss:$8 sps:$4 sm:$0xff]   ;;  %s2353_s27 = smov 84  }
  0x19   :  { %v2053_v19 = vpack.i.bf16 %v86_v15, %v84_v14  ;;  %v101_v22 = vsel %vm98_vm2, %v99_v10, %v100_v11  ;;  %v2043_v25 = vpack.i.bf16 %v52_v21, %v50_v20  ;;  %v103_v26 = vsel %vm98_vm2, %v100_v11, %v102_v16  ;;  %v2163_v30 = vld [vmem:[%s2818_s1 + $0x10] ss:$8 sps:$4 sm:$0xff]   ;;  %386 = vmatpush1.bf16.msra.mxu0 %v2160_v24  ;;  %s2354_s29 = smov 28   ;;  %v2164_v39 = vld [vmem:[%s2818_s1 + $0x24] ss:$8 sps:$4 sm:$0xff]   ;;  %s2355_s7 = smov 112  }
  0x1a   :  { %v66_v27 = vrot.slane %v2417_v1, 2  ;;  %v68_v28 = vrot.slane %v2422_v2, 2  ;;  %v2058_v31 = vpack.i.bf16 %v103_v26, %v101_v22  ;;  %v70_v32 = vrot.slane %v2431_v7, 2  ;;  %387 = vmatprep.subr.bf16.mxu0 %v2161_v29  ;;  %v2166_v51 = vld [vmem:[%s2818_s1 + $0x20] ss:$8 sps:$4 sm:$0xff]   ;;  %s2356_s10 = smov 56  }
  0x1b   :  { %2054 = vrot.lane.b32.xlu1 %v2053_v19, %s2353_s27  ;;  %v152_v33 = vrot.slane %v2440_v12, 2  ;;  %v154_v34 = vrot.slane %v2445_v13, 2  ;;  %2044 = vrot.lane.b32.xlu0 %v2043_v25, %s2354_s29  ;;  %v53_v37 = vrot.slane %v2431_v7, 1  ;;  %v134_v38 = vrot.slane %v2440_v12, 1  ;;  %v2167_v56 = vld [vmem:[%s2818_s1 + $0x34] ss:$8 sps:$4 sm:$0xff]  }
  0x1c   :  { %v67_v35 = vsel %vm64_vm3, %v65_v17, %v66_v27  ;;  %v69_v36 = vsel %vm64_vm3, %v66_v27, %v68_v28  ;;  %v136_v43 = vrot.slane %v2445_v13, 1  ;;  %v138_v46 = vrot.slane %v2462_v23, 1  ;;  %v2169_v62 = vld [vmem:[%s2818_s1 + $0x30] ss:$8 sps:$4 sm:$0xff]   ;;  %v2170_v6 = vld [vmem:[%s2818_s1 + $0x44] ss:$8 sps:$4 sm:$0xff]  }
  0x1d   :  { %v2048_v40 = vpack.i.bf16 %v69_v36, %v67_v35  ;;  %v153_v41 = vsel %vm64_vm3, %v70_v32, %v152_v33  ;;  %v155_v42 = vsel %vm64_vm3, %v152_v33, %v154_v34  ;;  %v135_v45 = vsel %vm47_vm1, %v53_v37, %v134_v38  ;;  %388 = vmatpush1.bf16.msra.mxu0 %v2163_v30  ;;  %v2172_v10 = vld [vmem:[%s2818_s1 + $0x40] ss:$8 sps:$4 sm:$0xff]   ;;  %v2173_v11 = vld [vmem:[%s2818_s1 + $0x54] ss:$8 sps:$4 sm:$0xff]   ;;  %v2175_v20 = vld [vmem:[%s2818_s1 + $0x50] ss:$8 sps:$4 sm:$0xff]  }
  0x1e   :  { %v2068_v44 = vpack.i.bf16 %v155_v42, %v153_v41  ;;  %v137_v47 = vsel %vm47_vm1, %v134_v38, %v136_v43  ;;  %v87_v48 = vrot.slane %v2431_v7, 3  ;;  %v170_v49 = vrot.slane %v2440_v12, 3  ;;  %389 = vmatprep.subr.bf16.mxu0 %v2164_v39  ;;  %v2176_v21 = vld [vmem:[%s2818_s1 + $0x64] ss:$8 sps:$4 sm:$0xff]   ;;  %v2178_v25 = vld [vmem:[%s2818_s1 + $0x60] ss:$8 sps:$4 sm:$0xff]  }
  0x1f   :  { %2059 = vrot.lane.b32.xlu1 %v2058_v31, %s2355_s7  ;;  %v172_v50 = vrot.slane %v2445_v13, 3  ;;  %2049 = vrot.lane.b32.xlu0 %v2048_v40, %s2356_s10  ;;  %v2063_v52 = vpack.i.bf16 %v137_v47, %v135_v45  ;;  %v54_v53 = vsel %vm47_vm1, %v51_v9, %v53_v37  ;;  %v139_v54 = vsel %vm47_vm1, %v136_v43, %v138_v46  ;;  %v2179_v26 = vld [vmem:[%s2818_s1 + $0x74] ss:$8 sps:$4 sm:$0xff]   ;;  %v2187_v29 = vld [vmem:[%s2818_s1 + $0x90] ss:$8 sps:$4 sm:$0xff]   ;;  %s2361_s24 = smov 88  }
  0x20   :  { %v156_v55 = vrot.slane %v2462_v23, 2  ;;  %v171_v57 = vsel %vm81_vm0, %v87_v48, %v170_v49  ;;  %v188_v59 = vrot.slane %v2440_v12, 4  ;;  %v189_v60 = vrot.slane %v2445_v13, 4  ;;  %v2181_v31 = vld [vmem:[%s2818_s1 + $0x70] ss:$8 sps:$4 sm:$0xff]   ;;  %s2362_s25 = smov 32  }
  0x21   :  { %v173_v58 = vsel %vm81_vm0, %v170_v49, %v172_v50  ;;  %v2078_v61 = vpack.i.bf16 %v139_v54, %v54_v53  ;;  %390 = vmatpush1.bf16.msra.mxu0 %v2166_v51  ;;  %v71_v3 = vsel %vm64_vm3, %v68_v28, %v70_v32  ;;  %v174_v9 = vrot.slane %v2462_v23, 3  ;;  %v2185_v28 = vld [vmem:[%s2818_s1 + $0x94] ss:$8 sps:$4 sm:$0xff]   ;;  %v2182_v32 = vld [vmem:[%s2818_s1 + $0x84] ss:$8 sps:$4 sm:$0x3f]  }
  0x22   :  { %v2073_v63 = vpack.i.bf16 %v173_v58, %v171_v57  ;;  %v157_v4 = vsel %vm64_vm3, %v154_v34, %v156_v55  ;;  %391 = vmatprep.subr.bf16.mxu0 %v2167_v56  ;;  %v190_v8 = vsel %vm98_vm2, %v188_v59, %v189_v60  ;;  %v104_v17 = vrot.slane %v2431_v7, 4  ;;  %584 = vmatprep.subr.bf16.mxu1 %v2185_v28  ;;  %v2188_v33 = vld [vmem:[%s2818_s1 + $0xa4] ss:$8 sps:$4 sm:$0xff]   ;;  %v2190_v35 = vld [vmem:[%s2818_s1 + $0xa0] ss:$8 sps:$4 sm:$0xff]   ;;  %s2363_s6 = smov [#allocation6]  }
  0x23   :  { %2069 = vrot.lane.b32.xlu1 %v2068_v44, %s2356_s10  ;;  %2064 = vrot.lane.b32.xlu0 %v2063_v52, %s2354_s29  ;;  %v2088_v14 = vpack.i.bf16 %v157_v4, %v71_v3  ;;  %v2083_v15 = vpack.i.bf16 %v190_v8, %v188_v59  ;;  %v88_v18 = vsel %vm81_vm0, %v85_v5, %v87_v48  ;;  %v191_v22 = vrot.slane %v2462_v23, 4  ;;  %v2191_v36 = vld [vmem:[%s2818_s1 + $0xb4] ss:$8 sps:$4 sm:$0xff]   ;;  %v2193_v37 = vld [vmem:[%s2818_s1 + $0xb0] ss:$8 sps:$4 sm:$0xff]   ;;  %s1721_s8 = sshll.u32 %s2363_s6, 4  ;;  %s1722_s8 = int_to_ptr.vmem [resolvable:$true] %s1721_s8 }
  0x24   :  { %v175_v19 = vsel %vm81_vm0, %v172_v50, %v174_v9  ;;  %v105_v5 = vsel %vm98_vm2, %v102_v16, %v104_v17  ;;  %v2184_v16 = vld [vmem:[%s2818_s1 + $0x80] ss:$8 sps:$4 sm:$0x3f]   ;;  %585 = vmatpush1.bf16.msra.mxu1 %v2187_v29  ;;  %v2194_v38 = vld [vmem:[%s2818_s1 + $0xc4] ss:$8 sps:$4 sm:$0xff]   ;;  %vm115_vm4 = vcmask 228352   ;;  %p2305_p9 = scmp.lt.s32.totalorder %s1722_s8, %s1722_s8 }
  0x25   :  { %392 = vmatpush1.bf16.msra.mxu0 %v2169_v62  ;;  %v2093_v24 = vpack.i.bf16 %v175_v19, %v88_v18  ;;  %v192_v27 = vsel %vm98_vm2, %v189_v60, %v191_v22  ;;  %v380_v34 = vsel %vm64_vm3, %v2184_v16, 0  ;;  %586 = vmatprep.subr.bf16.mxu1 %v2188_v33  ;;  %v2196_v39 = vld [vmem:[%s2818_s1 + $0xc0] ss:$8 sps:$4 sm:$0xff]   ;;  %v2197_v40 = vld [vmem:[%s2818_s1 + $0xd4] ss:$8 sps:$4 sm:$0xff]   ;;  %vm119_vm5 = vcmask 457728  }
  0x26   :  { %393 = vmatprep.subr.bf16.mxu0 %v2170_v6  ;;  %v2098_v30 = vpack.i.bf16 %v191_v22, %v192_v27  ;;  %v2199_v41 = vld [vmem:[%s2818_s1 + $0xd0] ss:$8 sps:$4 sm:$0xff]   ;;  %v2200_v42 = vld [vmem:[%s2818_s1 + $0xe4] ss:$8 sps:$4 sm:$0xff]   ;;  %v2202_v43 = vld [vmem:[%s2818_s1 + $0xe0] ss:$8 sps:$4 sm:$0xff]  }
  0x27   :  { %2079 = vrot.lane.b32.xlu1 %v2078_v61, %s2354_s29  ;;  %2074 = vrot.lane.b32.xlu0 %v2073_v63, %s2353_s27  ;;  %v2203_v44 = vld [vmem:[%s2818_s1 + $0xf4] ss:$8 sps:$4 sm:$0xff]   ;;  %vm369_vm6 = vcmask 97280   ;;  %vm123_vm7 = vcmask 687104   ;;  %vm127_vm8 = vcmask 916480   ;;  %vm574_vm9 = vcmask 130048  }
  0x28   :  { %587 = vmatpush1.bf16.msra.mxu1 %v2190_v35  ;;  %vm2358_vm10 = vmmov 0   ;;  %vm725_vm11 = vcmask 392192   ;;  %vm821_vm12 = vcmask 588800   ;;  %vm824_vm13 = vcmask 719872   ;;  %s2300_s9 = scalar_lea.vmem %s1722_s8, 32 }
  0x29   :  { %394 = vmatpush1.bf16.msra.mxu0 %v2172_v10  ;;  %588 = vmatprep.subr.bf16.mxu1 %v2191_v36  ;;  %vm826_vm14 = vcmask 261120   ;;  %vm1067_vm15 = vcmask 850944   ;;  %p2301_p8 = scmp.ne.s32.totalorder %s1722_s8, %s2300_s9  ;;  %p2306_p10 = scmp.lt.s32.totalorder %s2300_s9, %s2300_s9 }
  0x2a   :  { %395 = vmatprep.subr.bf16.mxu0 %v2173_v11 }
  0x2b   :  { %2089 = vrot.lane.b32.xlu1 %v2088_v14, %s2356_s10  ;;  %2084 = vrot.lane.b32.xlu0 %v2083_v15, %s2355_s7  ;;  %p2307_p11 = por %p2306_p10, %p2305_p9 }
  0x2c   :  { %589 = vmatpush1.bf16.msra.mxu1 %v2193_v37 }
  0x2d   :  { %396 = vmatpush1.bf16.msra.mxu0 %v2175_v20  ;;  %590 = vmatprep.subr.bf16.mxu1 %v2194_v38  ;;  %p2308_p12 = pnand %p2307_p11, %p2301_p8 }
  0x2e   :  { %397 = vmatprep.subr.bf16.mxu0 %v2176_v21 }
  0x2f   :  { %110 = vrot.lane.b32.xlu1 %v105_v5, %s2355_s7  ;;  %2094 = vrot.lane.b32.xlu0 %v2093_v24, %s2353_s27 }
  0x30   :  { %591 = vmatpush1.bf16.msra.mxu1 %v2196_v39 }
  0x31   :  { %398 = vmatpush1.bf16.msra.mxu0 %v2178_v25  ;;  %592 = vmatprep.subr.bf16.mxu1 %v2197_v40 }
  0x32   :  { %399 = vmatprep.subr.bf16.mxu0 %v2179_v26 }
  0x33   :  { %164 = vrot.lane.b32.xlu1 %v156_v55, %s2356_s10  ;;  %146 = vrot.lane.b32.xlu0 %v138_v46, %s2354_s29 }
  0x34   :  { %593 = vmatpush1.bf16.msra.mxu1 %v2199_v41 }
  0x35   :  { %400 = vmatpush1.bf16.msra.mxu0 %v2181_v31  ;;  %594 = vmatprep.subr.bf16.mxu1 %v2200_v42 }
  0x36   :  { %1752 = vmatprep.subr.msk.bf16.mxu0 %vm64_vm3, %v2182_v32 }
  0x37   :  { %2099 = vrot.lane.b32.xlu1 %v2098_v30, %s2355_s7  ;;  %182 = vrot.lane.b32.xlu0 %v174_v9, %s2353_s27 }
  0x38   :  { %595 = vmatpush1.bf16.msra.mxu1 %v2202_v43 }
  0x39   :  { %402 = vmatpush1.bf16.msra.mxu0 %v380_v34  ;;  %596 = vmatprep.subr.bf16.mxu1 %v2203_v44 }
  0x8d   :  { %v2055_v45 = vpop.permute.xlu1 %2054  ;;  %v2045_v46 = vpop.permute.xlu0 %2044 }
  0x8e   :  { %v2047_v47 = vunpack.i.h.bf16 %v2045_v46  ;;  %v2046_v48 = vunpack.i.l.bf16 %v2045_v46  ;;  %v2057_v53 = vunpack.i.h.bf16 %v2055_v45  ;;  %v2056_v56 = vunpack.i.l.bf16 %v2055_v45 }
  0x90   :  { %v117_v57 = vsel %vm115_vm4, %v2417_v1, %v2047_v47  ;;  %v116_v58 = vsel %vm115_vm4, %v2412_v0, %v2046_v48 }
  0x91   :  { %v2060_v49 = vpop.permute.xlu1 %2059  ;;  %v2050_v52 = vpop.permute.xlu0 %2049 }
  0x92   :  { %v2062_v50 = vunpack.i.h.bf16 %v2060_v49  ;;  %v2061_v51 = vunpack.i.l.bf16 %v2060_v49  ;;  %v2052_v54 = vunpack.i.h.bf16 %v2050_v52  ;;  %v2051_v55 = vunpack.i.l.bf16 %v2050_v52 }
  0x94   :  { %v264_v59 = vpack.c.bf16 %v2062_v50, %v2061_v51  ;;  %v120_v60 = vsel %vm119_vm5, %v116_v58, %v2051_v55  ;;  %v121_v61 = vsel %vm119_vm5, %v117_v57, %v2052_v54 }
  0x95   :  { %v2070_v62 = vpop.permute.xlu1 %2069  ;;  %v2065_v63 = vpop.permute.xlu0 %2064  ;;  %v124_v3 = vsel %vm123_vm7, %v120_v60, %v2056_v56  ;;  %v125_v4 = vsel %vm123_vm7, %v121_v61, %v2057_v53 }
  0x96   :  { %1753 = vmatprep.mubr.msk.bf16.mxu0 %vm369_vm6, %v264_v59  ;;  %v128_v6 = vsel %vm127_vm8, %v124_v3, %v2061_v51  ;;  %v129_v1 = vsel %vm127_vm8, %v125_v4, %v2062_v50  ;;  %v2067_v8 = vunpack.i.h.bf16 %v2065_v63  ;;  %v2066_v9 = vunpack.i.l.bf16 %v2065_v63 }
  0x97   :  { %v263_v0 = vpack.c.bf16 %v129_v1, %v128_v6  ;;  %v2072_v14 = vunpack.i.h.bf16 %v2070_v62  ;;  %v2071_v15 = vunpack.i.l.bf16 %v2070_v62 }
  0x98   :  { %v206_v17 = vsel %vm115_vm4, %v2440_v12, %v2067_v8  ;;  %v205_v18 = vsel %vm115_vm4, %v2431_v7, %v2066_v9  ;;  %v2205_v9 = vld [vmem:[%s2818_s1 + $0xf0] ss:$8 sps:$4 sm:$0xff]  }
  0x99   :  { %v2080_v10 = vpop.permute.xlu1 %2079  ;;  %v2075_v11 = vpop.permute.xlu0 %2074  ;;  %418 = vmatmul.mubr.bf16.vlgmr.msra.gmra.mrb[0].mxu0 %v263_v0  ;;  %v209_v24 = vsel %vm119_vm5, %v205_v18, %v2071_v15  ;;  %v210_v25 = vsel %vm119_vm5, %v206_v17, %v2072_v14  ;;  %597 = vmatpush1.bf16.msra.mxu1 %v2205_v9  ;;  %v2206_v0 = vld [vmem:[%s2818_s1 + $0x104] ss:$8 sps:$4 sm:$0xff]   ;;  %v2211_v14 = vld [vmem:[%s2818_s1 + $0x110] ss:$8 sps:$4 sm:$0xff]   ;;  %v271_v15 = vlaneseq }
  0x9a   :  { %v2077_v19 = vunpack.i.h.bf16 %v2075_v11  ;;  %v2076_v20 = vunpack.i.l.bf16 %v2075_v11  ;;  %v2081_v22 = vunpack.i.l.bf16 %v2080_v10  ;;  %v2082_v41 = vunpack.i.h.bf16 %v2080_v10  ;;  %v2208_v10 = vld [vmem:[%s2818_s1 + $0x100] ss:$8 sps:$4 sm:$0xff]   ;;  %598 = vmatprep.subr.bf16.mxu1 %v2206_v0  ;;  %v2209_v11 = vld [vmem:[%s2818_s1 + $0x114] ss:$8 sps:$4 sm:$0xff]   ;;  %s2359_s1 = smov 72  }
  0x9b   :  { %v272_v17 = vshrl.u32 %v271_v15, 7 }
  0x9c   :  { %v213_v16 = vsel %vm123_vm7, %v209_v24, %v2076_v20  ;;  %v214_v28 = vsel %vm123_vm7, %v210_v25, %v2077_v19  ;;  %v118_v36 = vsel %vm115_vm4, %v2422_v2, %v2081_v22  ;;  %v207_v50 = vsel %vm115_vm4, %v2445_v13, %v2082_v41  ;;  %v269_v19 = vld [vmem:[%s2820_s3] ss:$8 sm:$0x3] }
  0x9d   :  { %v2090_v21 = vpop.permute.xlu1 %2089  ;;  %v2085_v5 = vpop.permute.xlu0 %2084  ;;  %599 = vmatpush1.bf16.msra.mxu1 %v2208_v10  ;;  %v273_v18 = vsub.s32 0, %v272_v17  ;;  %v277_v20 = vsub.s32 1, %v272_v17 }
  0x9e   :  { %v2087_v26 = vunpack.i.h.bf16 %v2085_v5  ;;  %v2086_v27 = vunpack.i.l.bf16 %v2085_v5  ;;  %v2091_v29 = vunpack.i.l.bf16 %v2090_v21  ;;  %v2092_v44 = vunpack.i.h.bf16 %v2090_v21  ;;  %600 = vmatprep.subr.bf16.mxu1 %v2209_v11 }
  0x9f   :  { %v274_v21 = vrot.slane %v269_v19, %v273_v18  ;;  %v278_v22 = vrot.slane %v269_v19, %v277_v20 }
  0xa0   :  { %v229_v12 = vrot.slane %v2087_v26, 4  ;;  %v217_v30 = vsel %vm127_vm8, %v213_v16, %v2086_v27  ;;  %v218_v7 = vsel %vm127_vm8, %v214_v28, %v2087_v26  ;;  %v228_v31 = vrot.slane %v2086_v27, 4 }
  0xa1   :  { %v111_v32 = vpop.permute.xlu1 %110  ;;  %v225_v33 = vrot.slane %v217_v30, 4  ;;  %v226_v34 = vrot.slane %v218_v7, 4  ;;  %v2095_v35 = vpop.permute.xlu0 %2094  ;;  %v122_v39 = vsel %vm119_vm5, %v118_v36, %v2091_v29  ;;  %v211_v52 = vsel %vm119_vm5, %v207_v50, %v2092_v44  ;;  %601 = vmatpush1.bf16.msra.mxu1 %v2211_v14 }
  0xa2   :  { %v230_v37 = vsel %vm98_vm2, %v228_v31, %v229_v12  ;;  %v2096_v38 = vunpack.i.l.bf16 %v2095_v35  ;;  %v2097_v48 = vunpack.i.h.bf16 %v2095_v35 }
  0xa3   :  { %v266_v40 = vpack.c.bf16 %v230_v37, %v111_v32  ;;  %v227_v47 = vsel %vm98_vm2, %v225_v33, %v226_v34 }
  0xa4   :  { %v126_v42 = vsel %vm123_vm7, %v122_v39, %v2096_v38  ;;  %v215_v57 = vsel %vm123_vm7, %v211_v52, %v2097_v48 }
  0xa5   :  { %v165_v43 = vpop.permute.xlu1 %164  ;;  %v147_v45 = vpop.permute.xlu0 %146  ;;  %1754 = vmatprep.mubr.msk.bf16.mxu0 %vm369_vm6, %v266_v40  ;;  %v130_v46 = vsel %vm127_vm8, %v126_v42, %v111_v32 }
  0xa6   :  { %v208_v2 = vsel %vm115_vm4, %v2462_v23, %v147_v45  ;;  %v265_v49 = vpack.c.bf16 %v227_v47, %v130_v46 }
  0xa7   :  { %v212_v55 = vsel %vm119_vm5, %v208_v2, %v165_v43 }
  0xa8   :  { %428 = vmatmul.mubr.bf16.gmra.mrb[4].mxu0 %v265_v49 }
  0xa9   :  { %v2100_v51 = vpop.permute.xlu1 %2099  ;;  %v183_v56 = vpop.permute.xlu0 %182 }
  0xaa   :  { %v2102_v53 = vunpack.i.h.bf16 %v2100_v51  ;;  %v2101_v54 = vunpack.i.l.bf16 %v2100_v51  ;;  %v216_v58 = vsel %vm123_vm7, %v212_v55, %v183_v56 }
  0xac   :  { %v237_v59 = vrot.slane %v2102_v53, 4  ;;  %v219_v23 = vsel %vm127_vm8, %v215_v57, %v2101_v54  ;;  %v233_v60 = vrot.slane %v2101_v54, 4  ;;  %v220_v61 = vsel %vm127_vm8, %v216_v58, %v2102_v53 }
  0xad   :  { %v231_v13 = vrot.slane %v219_v23, 4  ;;  %v235_v62 = vrot.slane %v220_v61, 4 }
  0xae   :  { %v234_v63 = vsel %vm98_vm2, %v229_v12, %v233_v60  ;;  %v238_v3 = vsel %vm98_vm2, %v233_v60, %v237_v59  ;;  %v2357_v60 = vmov 0.0  }
  0xaf   :  { %v268_v4 = vpack.c.bf16 %v238_v3, %v234_v63  ;;  %v232_v6 = vsel %vm98_vm2, %v226_v34, %v231_v13  ;;  %v236_v1 = vsel %vm98_vm2, %v231_v13, %v235_v62  ;;  %1932 = vmatprep.subr.bf16.mxu0 %v2357_v60 }
  0xb0   :  { %v267_v8 = vpack.c.bf16 %v236_v1, %v232_v6 }
  0xb1   :  { %1755 = vmatprep.mubr.msk.bf16.mxu0 %vm369_vm6, %v268_v4 }
  0xb2   :  { %438 = vmatmul.mubr.bf16.gmra.mrb[8].mxu0 %v267_v8 }
  0xb3   :  { %1938 = vmatprep.mubr.msk.bf16.mxu0 %vm2358_vm10, %v2357_v60 }
 0x16c   :  { %v419_v5 = vpop.f32.mrb[0].mxu0 }
 0x16d   :  { %v420_v24 = vadd.f32 %v419_v5, %v274_v21  ;;  %v421_v25 = vpop.f32.mrb[1].mxu0 }
 0x16e   :  { %v422_v26 = vadd.f32 %v421_v25, %v278_v22  ;;  %v423_v27 = vpop.f32.mrb[2].mxu0 }
 0x16f   :  { %v424_v16 = vadd.f32 %v423_v27, %v274_v21  ;;  %v425_v28 = vpop.f32.mrb[3].mxu0  ;;  %v448_v12 = vmax.f32 %v420_v24, 0.0 }
 0x170   :  { %v426_v29 = vadd.f32 %v425_v28, %v278_v22  ;;  %v449_v7 = vmax.f32 %v422_v26, 0.0 }
 0x171   :  { %v450_v30 = vmax.f32 %v424_v16, 0.0 }
 0x172   :  { %v451_v31 = vmax.f32 %v426_v29, 0.0 }
 0x173   :  { %v478_v32 = vpack.c.bf16 %v450_v30, %v448_v12 }
 0x174   :  { %v479_v33 = vpack.c.bf16 %v451_v31, %v449_v7 }
 0x176   :  { %1774 = vmatprep.mubr.msk.bf16.mxu1 %vm574_vm9, %v479_v33 }
 0x177   :  { %617 = vmatmul.mubr.bf16.vlgmr.msra.gmra.mrb[0].mxu1 %v478_v32 }
 0x17b   :  { %v429_v34 = vpop.f32.mrb[4].mxu0 }
 0x17c   :  { %v430_v35 = vadd.f32 %v429_v34, %v274_v21  ;;  %v431_v36 = vpop.f32.mrb[5].mxu0 }
 0x17d   :  { %v432_v37 = vadd.f32 %v431_v36, %v278_v22  ;;  %v433_v38 = vpop.f32.mrb[6].mxu0 }
 0x17e   :  { %v434_v39 = vadd.f32 %v433_v38, %v274_v21  ;;  %v435_v40 = vpop.f32.mrb[7].mxu0  ;;  %v452_v42 = vmax.f32 %v430_v35, 0.0 }
 0x17f   :  { %v436_v41 = vadd.f32 %v435_v40, %v278_v22  ;;  %v453_v44 = vmax.f32 %v432_v37, 0.0 }
 0x180   :  { %v454_v43 = vmax.f32 %v434_v39, 0.0 }
 0x181   :  { %v455_v45 = vmax.f32 %v436_v41, 0.0 }
 0x182   :  { %v480_v46 = vpack.c.bf16 %v454_v43, %v452_v42 }
 0x183   :  { %v481_v47 = vpack.c.bf16 %v455_v45, %v453_v44 }
 0x185   :  { %v439_v48 = vpop.f32.mrb[8].mxu0  ;;  %1775 = vmatprep.mubr.msk.bf16.mxu1 %vm574_vm9, %v481_v47 }
 0x186   :  { %v440_v2 = vadd.f32 %v439_v48, %v274_v21  ;;  %v441_v49 = vpop.f32.mrb[9].mxu0  ;;  %627 = vmatmul.mubr.bf16.gmra.mrb[4].mxu1 %v480_v46 }
 0x187   :  { %v442_v50 = vadd.f32 %v441_v49, %v278_v22  ;;  %v443_v51 = vpop.f32.mrb[10].mxu0  ;;  %v2212_v49 = vld [vmem:[#allocation2 + $0xf8] sm:$0xff]  }
 0x188   :  { %v444_v52 = vadd.f32 %v443_v51, %v274_v21  ;;  %v445_v53 = vpop.f32.mrb[11].mxu0  ;;  %v456_v55 = vmax.f32 %v440_v2, 0.0  ;;  %v2214_v51 = vld [vmem:[#allocation2 + $0x108] sm:$0xff]  }
 0x189   :  { %v446_v54 = vadd.f32 %v445_v53, %v278_v22  ;;  %v457_v57 = vmax.f32 %v442_v50, 0.0  ;;  %v2213_v50 = vld [vmem:[#allocation2 + $0x100] sm:$0xff]  }
 0x18a   :  { %v458_v56 = vmax.f32 %v444_v52, 0.0  ;;  %v2215_v52 = vld [vmem:[#allocation2 + $0x40] sm:$0xff]  }
 0x18b   :  { %v459_v58 = vmax.f32 %v446_v54, 0.0  ;;  %v2216_v53 = vld [vmem:[#allocation2] sm:$0xff]   ;;  %v2217_v54 = vld [vmem:[#allocation2 + $0x48] sm:$0xff]   ;;  %1853 = vmatprep.subr.bf16.mxu1 %v2215_v52 }
 0x18c   :  { %v482_v59 = vpack.c.bf16 %v458_v56, %v456_v55  ;;  %v2221_v55 = vld [vmem:[#allocation2 + $0x80] sm:$0xff]   ;;  %1854 = vmatpush3.bf16.msra.mxu1 %v2216_v53  ;;  %v2218_v56 = vld [vmem:[#allocation2 + $0x8] sm:$0xff]  }
 0x18d   :  { %v483_v23 = vpack.c.bf16 %v459_v58, %v457_v57  ;;  %1855 = vmatprep.subr.bf16.mxu1 %v2217_v54  ;;  %v2219_v57 = vld [vmem:[#allocation2 + $0x50] sm:$0xff]   ;;  %v2224_v58 = vld [vmem:[#allocation2 + $0x88] sm:$0xff]  }
 0x18f   :  { %1776 = vmatprep.mubr.msk.bf16.mxu1 %vm574_vm9, %v483_v23  ;;  %v2222_v23 = vld [vmem:[#allocation2 + $0x58] sm:$0xff]  }
 0x190   :  { %637 = vmatmul.mubr.bf16.gmra.mrb[8].mxu1 %v482_v59  ;;  %v2220_v59 = vld [vmem:[#allocation2 + $0x10] sm:$0xff]  }
 0x191   :  { %1856 = vmatpush3.bf16.msra.mxu1 %v2218_v56 }
 0x192   :  { %1857 = vmatprep.subr.bf16.mxu1 %v2219_v57 }
 0x195   :  { %1858 = vmatpush3.bf16.msra.mxu1 %v2220_v59 }
 0x196   :  { %1859 = vmatprep.subr.bf16.mxu1 %v2222_v23 }
 0x24a   :  { %v618_v61 = vpop.f32.mrb[0].mxu1 }
 0x24b   :  { %v620_v13 = vpop.f32.mrb[1].mxu1 }
 0x24c   :  { %v2103_v62 = vpack.i.bf16 %v620_v13, %v618_v61  ;;  %v622_v63 = vpop.f32.mrb[2].mxu1 }
 0x24d   :  { %v624_v3 = vpop.f32.mrb[3].mxu1 }
 0x24e   :  { %v2108_v4 = vpack.i.bf16 %v624_v3, %v622_v63  ;;  %2104 = vrot.lane.b32.xlu0 %v2103_v62, %s2356_s10 }
 0x250   :  { %2109 = vrot.lane.b32.xlu1 %v2108_v4, %s2356_s10 }
 0x259   :  { %v628_v6 = vpop.f32.mrb[4].mxu1 }
 0x25a   :  { %v630_v1 = vpop.f32.mrb[5].mxu1 }
 0x25b   :  { %v2113_v8 = vpack.i.bf16 %v630_v1, %v628_v6  ;;  %v632_v9 = vpop.f32.mrb[6].mxu1  ;;  %v2225_v1 = vld [vmem:[#allocation2 + $0x60] sm:$0xff]  }
 0x25c   :  { %v634_v0 = vpop.f32.mrb[7].mxu1 }
 0x25d   :  { %v2118_v10 = vpack.i.bf16 %v634_v0, %v632_v9  ;;  %2114 = vrot.lane.b32.xlu0 %v2113_v8, %s2356_s10  ;;  %v2226_v8 = vld [vmem:[#allocation2 + $0x20] sm:$0xff]  }
 0x25f   :  { %2119 = vrot.lane.b32.xlu1 %v2118_v10, %s2356_s10 }
 0x263   :  { %v638_v11 = vpop.f32.mrb[8].mxu1 }
 0x264   :  { %v640_v14 = vpop.f32.mrb[9].mxu1 }
 0x265   :  { %v2123_v15 = vpack.i.bf16 %v640_v14, %v638_v11  ;;  %v642_v17 = vpop.f32.mrb[10].mxu1  ;;  %v2228_v14 = vld [vmem:[#allocation2 + $0x68] sm:$0xff]  }
 0x266   :  { %v644_v18 = vpop.f32.mrb[11].mxu1 }
 0x267   :  { %v2128_v19 = vpack.i.bf16 %v644_v18, %v642_v17  ;;  %2124 = vrot.lane.b32.xlu0 %v2123_v15, %s2356_s10  ;;  %v2229_v15 = vld [vmem:[#allocation2 + $0x28] sm:$0xff]  }
 0x269   :  { %2129 = vrot.lane.b32.xlu1 %v2128_v19, %s2356_s10  ;;  %s2360_s10 = smov 16  }
 0x2c0   :  { %v2105_v20 = vpop.permute.xlu0 %2104 }
 0x2c1   :  { %v2107_v21 = vunpack.i.h.bf16 %v2105_v20  ;;  %v2106_v22 = vunpack.i.l.bf16 %v2105_v20 }
 0x2c2   :  { %v2110_v5 = vpop.permute.xlu1 %2109 }
 0x2c3   :  { %v683_v24 = vsel %vm119_vm5, %v2106_v22, %v2107_v21  ;;  %v2112_v25 = vunpack.i.h.bf16 %v2110_v5  ;;  %v2111_v26 = vunpack.i.l.bf16 %v2110_v5  ;;  %v2231_v21 = vld [vmem:[#allocation2 + $0x70] sm:$0xff]  }
 0x2c4   :  { %v695_v16 = vmax.f32 %v618_v61, %v683_v24  ;;  %v2223_v61 = vld [vmem:[#allocation2 + $0x18] sm:$0xff]   ;;  %v2232_v5 = vld [vmem:[#allocation2 + $0x30] sm:$0xff]  }
 0x2c5   :  { %v684_v27 = vsel %vm119_vm5, %v2111_v26, %v2112_v25  ;;  %1860 = vmatpush3.bf16.msra.mxu1 %v2223_v61 }
 0x2c6   :  { %v696_v28 = vmax.f32 %v622_v63, %v684_v27  ;;  %1861 = vmatprep.subr.bf16.mxu1 %v2225_v1 }
 0x2c8   :  { %v707_v29 = vpack.c.bf16 %v696_v28, %v695_v16  ;;  %v2233_v16 = vld [vmem:[#allocation2 + $0xa0] sm:$0xff]  }
 0x2c9   :  { %1862 = vmatpush3.bf16.msra.mxu1 %v2226_v8 }
 0x2ca   :  { %1933 = vmatpush3.bf16.msra.mxu0 %v707_v29  ;;  %1863 = vmatprep.subr.bf16.mxu1 %v2228_v14 }
 0x2cb   :  { %1934 = vmatprep.subr.bf16.mxu0 %v2357_v60 }
 0x2cd   :  { %1864 = vmatpush3.bf16.msra.mxu1 %v2229_v15 }
 0x2ce   :  { %1865 = vmatprep.subr.bf16.mxu1 %v2231_v21 }
 0x2cf   :  { %v2115_v12 = vpop.permute.xlu0 %2114 }
 0x2d0   :  { %v2117_v30 = vunpack.i.h.bf16 %v2115_v12  ;;  %v2116_v7 = vunpack.i.l.bf16 %v2115_v12 }
 0x2d1   :  { %v2120_v31 = vpop.permute.xlu1 %2119  ;;  %1866 = vmatpush3.bf16.msra.mxu1 %v2232_v5 }
 0x2d2   :  { %v685_v32 = vsel %vm119_vm5, %v2116_v7, %v2117_v30  ;;  %v2122_v33 = vunpack.i.h.bf16 %v2120_v31  ;;  %v2121_v34 = vunpack.i.l.bf16 %v2120_v31  ;;  %v2234_v7 = vld [vmem:[#allocation2 + $0x78] sm:$0xff]  }
 0x2d3   :  { %v697_v36 = vmax.f32 %v628_v6, %v685_v32  ;;  %v2235_v32 = vld [vmem:[#allocation2 + $0x38] sm:$0xff]   ;;  %1867 = vmatprep.subr.bf16.mxu1 %v2234_v7 }
 0x2d4   :  { %v686_v35 = vsel %vm119_vm5, %v2121_v34, %v2122_v33  ;;  %v2236_v33 = vld [vmem:[#allocation2 + $0xa8] sm:$0xff]   ;;  %v2242_v7 = vld [vmem:[#allocation2 + $0xd8] sm:$0xff]  }
 0x2d5   :  { %v698_v37 = vmax.f32 %v632_v9, %v686_v35  ;;  %v2227_v9 = vld [vmem:[#allocation2 + $0x90] sm:$0xff]   ;;  %1868 = vmatpush3.bf16.msra.mxu1 %v2235_v32  ;;  %v2244_v32 = vld [vmem:[#allocation2 + $0xe8] sm:$0xff]  }
 0x2d6   :  { %1968 = vmatprep.subr.bf16.mxu1 %v2357_v60 }
 0x2d7   :  { %v708_v38 = vpack.c.bf16 %v698_v37, %v697_v36 }
 0x2d9   :  { %v2125_v39 = vpop.permute.xlu0 %2124  ;;  %1935 = vmatpush3.bf16.msra.mxu0 %v708_v38 }
 0x2da   :  { %v2127_v40 = vunpack.i.h.bf16 %v2125_v39  ;;  %v2126_v41 = vunpack.i.l.bf16 %v2125_v39  ;;  %1936 = vmatprep.subr.bf16.mxu0 %v2357_v60 }
 0x2db   :  { %v2130_v42 = vpop.permute.xlu1 %2129 }
 0x2dc   :  { %v687_v43 = vsel %vm119_vm5, %v2126_v41, %v2127_v40  ;;  %v2132_v44 = vunpack.i.h.bf16 %v2130_v42  ;;  %v2131_v45 = vunpack.i.l.bf16 %v2130_v42  ;;  %v2237_v40 = vld [vmem:[#allocation2 + $0xb0] ss:$0 sps:$4 sm:$0xff]  }
 0x2dd   :  { %v699_v47 = vmax.f32 %v638_v11, %v687_v43  ;;  %v1072_v43 = vsel %vm98_vm2, %v2237_v40, 0 }
 0x2de   :  { %v688_v46 = vsel %vm119_vm5, %v2131_v45, %v2132_v44 }
 0x2df   :  { %v700_v48 = vmax.f32 %v642_v17, %v688_v46  ;;  %v2230_v17 = vld [vmem:[#allocation2 + $0x98] sm:$0xff]  }
 0x2e1   :  { %v709_v2 = vpack.c.bf16 %v700_v48, %v699_v47 }
 0x2e3   :  { %1937 = vmatpush3.bf16.msra.mxu0 %v709_v2 }
 0x2e4   :  { %1950 = vmatprep.subr.bf16.mxu0 %v2357_v60 }
 0x2e6   :  { %1939 = vmatmul.mubr.msk.bf16.vlgmr.msra.gmra.mrb[12].mxu0 %vm725_vm11, %v2212_v49 }
 0x2e7   :  { %1942 = vmatprep.mubr.msk.bf16.mxu0 %vm2358_vm10, %v2357_v60  ;;  %1951 = vmatpush3.bf16.msra.mxu0 %v2221_v55 }
 0x2e8   :  { %1952 = vmatprep.subr.bf16.mxu0 %v2357_v60 }
 0x2eb   :  { %1953 = vmatpush3.bf16.msra.mxu0 %v2224_v58 }
 0x2ec   :  { %1954 = vmatprep.subr.bf16.mxu0 %v2357_v60 }
 0x2ee   :  { %1943 = vmatmul.mubr.msk.bf16.gmra.mrb[16].mxu0 %vm725_vm11, %v2213_v50 }
 0x2ef   :  { %1946 = vmatprep.mubr.msk.bf16.mxu0 %vm2358_vm10, %v2357_v60  ;;  %1955 = vmatpush3.bf16.msra.mxu0 %v2227_v9 }
 0x2f0   :  { %1956 = vmatprep.subr.bf16.mxu0 %v2357_v60 }
 0x2f3   :  { %1957 = vmatpush3.bf16.msra.mxu0 %v2230_v17 }
 0x2f4   :  { %1958 = vmatprep.subr.bf16.mxu0 %v2357_v60 }
 0x2f6   :  { %1947 = vmatmul.mubr.msk.bf16.gmra.mrb[20].mxu0 %vm725_vm11, %v2214_v51 }
 0x2f7   :  { %1964 = vmatprep.mubr.msk.bf16.mxu0 %vm2358_vm10, %v2357_v60  ;;  %1959 = vmatpush3.bf16.msra.mxu0 %v2233_v16  ;;  %v2239_v16 = vld [vmem:[#allocation2 + $0xc0] sm:$0xff]  }
 0x2f8   :  { %1960 = vmatprep.subr.bf16.mxu0 %v2357_v60 }
 0x2fb   :  { %1961 = vmatpush3.bf16.msra.mxu0 %v2236_v33  ;;  %v2245_v33 = vld [vmem:[#allocation2 + $0xf0] sm:$0xff]  }
 0x2fc   :  { %1962 = vmatprep.subr.bf16.mxu0 %v2357_v60 }
 0x2ff   :  { %1963 = vmatpush3.bf16.msra.mxu0 %v1072_v43 }
 0x3b9   :  { %v769_v13 = vpop.f32.mrb[12].mxu0 }
 0x3ba   :  { %v1940_v62 = vpop.f32.mrb[13].mxu0 }
 0x3bb   :  { %v772_v63 = vpop.f32.mrb[14].mxu0 }
 0x3bc   :  { %v1941_v3 = vpop.f32.mrb[15].mxu0 }
 0x3c1   :  { %v777_v4 = vpop.f32.mrb[16].mxu0 }
 0x3c2   :  { %v1944_v6 = vpop.f32.mrb[17].mxu0 }
 0x3c3   :  { %v780_v0 = vpop.f32.mrb[18].mxu0 }
 0x3c4   :  { %v2709_v10 = vmax.f32 %v769_v13, %v780_v0  ;;  %v1945_v11 = vpop.f32.mrb[19].mxu0 }
 0x3c6   :  { %v797_v26 = vrot.slane %v2709_v10, 1  ;;  %v809_v41 = vrot.slane %v2709_v10, 3  ;;  %v815_v46 = vrot.slane %v2709_v10, 4  ;;  %v803_v47 = vrot.slane %v2709_v10, 2 }
 0x3c9   :  { %v785_v18 = vpop.f32.mrb[20].mxu0 }
 0x3ca   :  { %v2712_v19 = vmax.f32 %v772_v63, %v785_v18  ;;  %v1948_v20 = vpop.f32.mrb[21].mxu0 }
 0x3cb   :  { %v788_v22 = vpop.f32.mrb[22].mxu0  ;;  %v2238_v20 = vld [vmem:[#allocation2 + $0xb8] sm:$0xff]  }
 0x3cc   :  { %v794_v24 = vmax.f32 %v777_v4, %v788_v22  ;;  %v1949_v25 = vpop.f32.mrb[23].mxu0  ;;  %v798_v27 = vrot.slane %v2712_v19, 1  ;;  %v804_v29 = vrot.slane %v2712_v19, 2  ;;  %v810_v36 = vrot.slane %v2712_v19, 3 }
 0x3cd   :  { %v816_v45 = vrot.slane %v2712_v19, 4 }
 0x3ce   :  { %v799_v28 = vsel %vm47_vm1, %v797_v26, %v798_v27  ;;  %v837_v12 = vrot.slane %v794_v24, 2  ;;  %v829_v30 = vrot.slane %v794_v24, 1  ;;  %v845_v31 = vrot.slane %v794_v24, 3 }
 0x3cf   :  { %800 = vrot.lane.b32.xlu1 %v799_v28, %s2359_s1  ;;  %v811_v44 = vsel %vm81_vm0, %v809_v41, %v810_v36  ;;  %v817_v48 = vsel %vm98_vm2, %v815_v46, %v816_v45  ;;  %v805_v2 = vsel %vm64_vm3, %v803_v47, %v804_v29  ;;  %v853_v49 = vrot.slane %v794_v24, 4 }
 0x3d0   :  { %v838_v34 = vsel %vm64_vm3, %v804_v29, %v837_v12  ;;  %v830_v35 = vsel %vm47_vm1, %v798_v27, %v829_v30  ;;  %v846_v39 = vsel %vm81_vm0, %v810_v36, %v845_v31  ;;  %v931_v36 = vld [vmem:[%s2820_s3 + $0x1] ss:$0 sm:$0xff]  ;;  %vm1289_vm0 = vcmask 523264  }
 0x3d1   :  { %v2138_v37 = vpack.i.bf16 %v837_v12, %v838_v34  ;;  %v2133_v38 = vpack.i.bf16 %v829_v30, %v830_v35  ;;  %v2143_v42 = vpack.i.bf16 %v845_v31, %v846_v39  ;;  %v2240_v12 = vld [vmem:[#allocation2 + $0xc8] sm:$0xff]   ;;  %v2241_v30 = vld [vmem:[#allocation2 + $0xd0] sm:$0xff]   ;;  %v2243_v31 = vld [vmem:[#allocation2 + $0xe0] sm:$0xff]   ;;  %vm1315_vm1 = vcmask 1040384  }
 0x3d3   :  { %2139 = vrot.lane.b32.xlu1 %v2138_v37, %s2360_s10  ;;  %2134 = vrot.lane.b32.xlu0 %v2133_v38, %s2359_s1 }
 0x3d7   :  { %812 = vrot.lane.b32.xlu1 %v811_v44, %s2361_s24  ;;  %2144 = vrot.lane.b32.xlu0 %v2143_v42, %s2361_s24 }
 0x3db   :  { %818 = vrot.lane.b32.xlu1 %v817_v48, %s2362_s25  ;;  %806 = vrot.lane.b32.xlu0 %v805_v2, %s2360_s10 }
 0x3df   :  { %854 = vrot.lane.b32.xlu0 %v853_v49, %s2362_s25 }
 0x441   :  { %v801_v50 = vpop.permute.xlu1 %800 }
 0x442   :  { %v822_v18 = vsel %vm821_vm12, %v2709_v10, %v801_v50 }
 0x445   :  { %v2140_v51 = vpop.permute.xlu1 %2139  ;;  %v2135_v52 = vpop.permute.xlu0 %2134 }
 0x446   :  { %v2137_v53 = vunpack.i.h.bf16 %v2135_v52  ;;  %v2136_v54 = vunpack.i.l.bf16 %v2135_v52  ;;  %v2142_v55 = vunpack.i.h.bf16 %v2140_v51  ;;  %v2141_v56 = vunpack.i.l.bf16 %v2140_v51  ;;  %v2246_v52 = vld [vmem:[#allocation2 + $0x150] sm:$0xff]  }
 0x447   :  { %1892 = vmatprep.subr.bf16.mxu0 %v2246_v52  ;;  %v2274_v52 = vld [vmem:[#allocation2 + $0x1f0] sm:$0xff]  }
 0x448   :  { %v858_v57 = vsel %vm821_vm12, %v794_v24, %v2137_v53  ;;  %v857_v58 = vsel %vm821_vm12, %v2712_v19, %v2136_v54  ;;  %v860_v63 = vsel %vm574_vm9, %v2137_v53, %v2142_v55  ;;  %v859_v3 = vsel %vm574_vm9, %v2136_v54, %v2141_v56  ;;  %v2247_v53 = vld [vmem:[#allocation2 + $0x110] sm:$0xff]   ;;  %v2248_v54 = vld [vmem:[#allocation2 + $0x158] sm:$0xff]  }
 0x449   :  { %v2145_v59 = vpop.permute.xlu0 %2144  ;;  %v872_v23 = vrot.slane %v858_v57, 4  ;;  %v871_v61 = vrot.slane %v857_v58, 4  ;;  %v813_v4 = vpop.permute.xlu1 %812  ;;  %v2249_v58 = vld [vmem:[#allocation2 + $0x118] sm:$0xff]  }
 0x44a   :  { %v2147_v13 = vunpack.i.h.bf16 %v2145_v59  ;;  %v2146_v62 = vunpack.i.l.bf16 %v2145_v59  ;;  %v2250_v59 = vld [vmem:[#allocation2 + $0x160] sm:$0xff]  }
 0x44b   :  { %v873_v11 = vsel %vm98_vm2, %v871_v61, %v872_v23  ;;  %v2251_v23 = vld [vmem:[#allocation2 + $0x120] sm:$0xff]   ;;  %v2252_v61 = vld [vmem:[#allocation2 + $0x168] sm:$0xff]  }
 0x44c   :  { %v861_v6 = vsel %vm824_vm13, %v859_v3, %v2146_v62  ;;  %v862_v1 = vsel %vm824_vm13, %v860_v63, %v2147_v13  ;;  %v928_v22 = vpack.c.bf16 %v873_v11, %v822_v18  ;;  %v2255_v63 = vld [vmem:[#allocation2 + $0x130] sm:$0xff]   ;;  %v2256_v3 = vld [vmem:[#allocation2 + $0x178] sm:$0xff]  }
 0x44d   :  { %v874_v8 = vrot.slane %v861_v6, 4  ;;  %v875_v9 = vrot.slane %v862_v1, 4  ;;  %v807_v0 = vpop.permute.xlu0 %806  ;;  %v819_v5 = vpop.permute.xlu1 %818  ;;  %v2258_v1 = vld [vmem:[#allocation2 + $0x180] sm:$0xff]  }
 0x44e   :  { %v823_v14 = vsel %vm574_vm9, %v801_v50, %v807_v0  ;;  %v827_v28 = vsel %vm826_vm14, %v813_v4, %v819_v5 }
 0x44f   :  { %v825_v15 = vsel %vm824_vm13, %v823_v14, %v813_v4  ;;  %v876_v17 = vsel %vm98_vm2, %v874_v8, %v875_v9  ;;  %v2257_v4 = vld [vmem:[#allocation2 + $0x138] sm:$0xff]   ;;  %v2259_v9 = vld [vmem:[#allocation2 + $0x140] sm:$0xff]  }
 0x450   :  { %v929_v19 = vpack.c.bf16 %v876_v17, %v825_v15  ;;  %v2260_v15 = vld [vmem:[#allocation2 + $0x188] sm:$0xff]  }
 0x451   :  { %v855_v21 = vpop.permute.xlu0 %854  ;;  %v2261_v17 = vld [vmem:[#allocation2 + $0x148] sm:$0xff]  }
 0x452   :  { %v863_v24 = vsel %vm826_vm14, %v2146_v62, %v855_v21  ;;  %v864_v25 = vsel %vm826_vm14, %v2147_v13, %v855_v21  ;;  %1106 = vmatprep.mubr.bf16.mxu1 %v929_v19  ;;  %v2253_v13 = vld [vmem:[#allocation2 + $0x128] sm:$0xff]   ;;  %v2254_v62 = vld [vmem:[#allocation2 + $0x170] sm:$0xff]  }
 0x453   :  { %v877_v26 = vrot.slane %v863_v24, 4  ;;  %v878_v27 = vrot.slane %v864_v25, 4  ;;  %1107 = vmatmul.mubr.bf16.vlgmr.msra.gmra.mrb[12].mxu1 %v928_v22 }
 0x454   :  { %1969 = vmatpush3.bf16.msra.mxu1 %v2238_v20  ;;  %1984 = vmatprep.mubr.msk.bf16.mxu1 %vm2358_vm10, %v2357_v60 }
 0x455   :  { %v879_v10 = vsel %vm98_vm2, %v877_v26, %v878_v27  ;;  %1970 = vmatprep.subr.bf16.mxu1 %v2357_v60  ;;  %v2262_v26 = vld [vmem:[#allocation2 + $0x190] sm:$0xff]  }
 0x456   :  { %v930_v29 = vpack.c.bf16 %v879_v10, %v827_v28  ;;  %v2264_v28 = vld [vmem:[#allocation2 + $0x1a0] sm:$0xff]   ;;  %v2265_v10 = vld [vmem:[#allocation2 + $0x1a8] sm:$0xff]  }
 0x458   :  { %1965 = vmatmul.mubr.msk.bf16.vlgmr.msra.gmra.mrb[24].mxu0 %vm1067_vm15, %v930_v29  ;;  %1971 = vmatpush3.bf16.msra.mxu1 %v2239_v16  ;;  %v2263_v16 = vld [vmem:[#allocation2 + $0x198] sm:$0xff]   ;;  %v2266_v29 = vld [vmem:[#allocation2 + $0x1b0] sm:$0xff]  }
 0x459   :  { %1972 = vmatprep.subr.bf16.mxu1 %v2357_v60  ;;  %1893 = vmatpush3.bf16.msra.mxu0 %v2247_v53  ;;  %v2275_v53 = vld [vmem:[#allocation2 + $0x1f8] sm:$0xff]  }
 0x45a   :  { %1894 = vmatprep.subr.bf16.mxu0 %v2248_v54 }
 0x45c   :  { %1973 = vmatpush3.bf16.msra.mxu1 %v2240_v12  ;;  %v2267_v12 = vld [vmem:[#allocation2 + $0x1b8] sm:$0xff]  }
 0x45d   :  { %1974 = vmatprep.subr.bf16.mxu1 %v2357_v60  ;;  %1895 = vmatpush3.bf16.msra.mxu0 %v2249_v58 }
 0x45e   :  { %1896 = vmatprep.subr.bf16.mxu0 %v2250_v59 }
 0x460   :  { %1975 = vmatpush3.bf16.msra.mxu1 %v2241_v30 }
 0x461   :  { %1976 = vmatprep.subr.bf16.mxu1 %v2357_v60  ;;  %1897 = vmatpush3.bf16.msra.mxu0 %v2251_v23 }
 0x462   :  { %1898 = vmatprep.subr.bf16.mxu0 %v2252_v61 }
 0x464   :  { %1977 = vmatpush3.bf16.msra.mxu1 %v2242_v7 }
 0x465   :  { %1978 = vmatprep.subr.bf16.mxu1 %v2357_v60  ;;  %1899 = vmatpush3.bf16.msra.mxu0 %v2253_v13 }
 0x466   :  { %1900 = vmatprep.subr.bf16.mxu0 %v2254_v62  ;;  %v2276_v62 = vld [vmem:[#allocation2 + $0x200] sm:$0xff]  }
 0x468   :  { %1979 = vmatpush3.bf16.msra.mxu1 %v2243_v31 }
 0x469   :  { %1980 = vmatprep.subr.bf16.mxu1 %v2357_v60  ;;  %1901 = vmatpush3.bf16.msra.mxu0 %v2255_v63  ;;  %v2277_v63 = vld [vmem:[#allocation2 + $0x208] sm:$0xff]  }
 0x46a   :  { %1902 = vmatprep.subr.bf16.mxu0 %v2256_v3  ;;  %v1507_v3 = vld [vmem:[%s2820_s3 + $0x3] ss:$0 sm:$0xff] }
 0x46c   :  { %1981 = vmatpush3.bf16.msra.mxu1 %v2244_v32 }
 0x46d   :  { %1982 = vmatprep.subr.bf16.mxu1 %v2357_v60  ;;  %1903 = vmatpush3.bf16.msra.mxu0 %v2257_v4 }
 0x46e   :  { %1904 = vmatprep.subr.bf16.mxu0 %v2258_v1 }
 0x470   :  { %1983 = vmatpush3.bf16.msra.mxu1 %v2245_v33 }
 0x471   :  { %1988 = vmatprep.subr.bf16.mxu1 %v2357_v60  ;;  %1905 = vmatpush3.bf16.msra.mxu0 %v2259_v9 }
 0x472   :  { %1906 = vmatprep.subr.bf16.mxu0 %v2260_v15 }
 0x475   :  { %1907 = vmatpush3.bf16.msra.mxu0 %v2261_v17 }
 0x476   :  { %2008 = vmatprep.subr.bf16.mxu0 %v2357_v60 }
 0x526   :  { %v1869_v34 = vpop.f32.mrb[12].mxu1 }
 0x527   :  { %v1870_v35 = vpop.f32.mrb[13].mxu1 }
 0x528   :  { %v1871_v37 = vadd.f32 %v1870_v35, %v1869_v34  ;;  %v1872_v38 = vpop.f32.mrb[14].mxu1 }
 0x529   :  { %v1873_v39 = vpop.f32.mrb[15].mxu1 }
 0x52a   :  { %v1874_v40 = vadd.f32 %v1873_v39, %v1872_v38  ;;  %v1109_v41 = vadd.f32 %v1871_v37, %v931_v36 }
 0x52b   :  { %v1149_v42 = vpop.f32.mrb[24].mxu0 }
 0x52c   :  { %v1150_v43 = vadd.f32 %v1149_v42, %v1109_v41  ;;  %v1966_v44 = vpop.f32.mrb[25].mxu0  ;;  %v1112_v45 = vadd.f32 %v1874_v40, %v931_v36 }
 0x52d   :  { %v1152_v46 = vpop.f32.mrb[26].mxu0 }
 0x52e   :  { %v1153_v47 = vadd.f32 %v1152_v46, %v1112_v45  ;;  %v1967_v48 = vpop.f32.mrb[27].mxu0  ;;  %v1156_v2 = vmax.f32 %v1150_v43, 0.0 }
 0x52f   :  { %v2269_v48 = vld [vmem:[#allocation2 + $0x1c8] sm:$0xff]  }
 0x530   :  { %v1157_v49 = vmax.f32 %v1153_v47, 0.0  ;;  %v2268_v47 = vld [vmem:[#allocation2 + $0x1c0] sm:$0xff]  }
 0x532   :  { %v1174_v50 = vpack.c.bf16 %v1157_v49, %v1156_v2  ;;  %v2270_v2 = vld [vmem:[#allocation2 + $0x1d0] sm:$0xff]   ;;  %v2271_v49 = vld [vmem:[#allocation2 + $0x1d8] sm:$0xff]  }
 0x534   :  { %1985 = vmatmul.mubr.bf16.vlgmr.msra.gmra.mrb[16].mxu1 %v1174_v50  ;;  %v2272_v50 = vld [vmem:[#allocation2 + $0x1e0] sm:$0xff]  }
 0x535   :  { %2004 = vmatprep.mubr.msk.bf16.mxu1 %vm2358_vm10, %v2357_v60  ;;  %1989 = vmatpush3.bf16.msra.mxu1 %v2262_v26 }
 0x536   :  { %1990 = vmatprep.subr.bf16.mxu1 %v2357_v60 }
 0x539   :  { %1991 = vmatpush3.bf16.msra.mxu1 %v2263_v16 }
 0x53a   :  { %1992 = vmatprep.subr.bf16.mxu1 %v2357_v60 }
 0x53d   :  { %1993 = vmatpush3.bf16.msra.mxu1 %v2264_v28 }
 0x53e   :  { %1994 = vmatprep.subr.bf16.mxu1 %v2357_v60 }
 0x541   :  { %1995 = vmatpush3.bf16.msra.mxu1 %v2265_v10 }
 0x542   :  { %1996 = vmatprep.subr.bf16.mxu1 %v2357_v60 }
 0x545   :  { %1997 = vmatpush3.bf16.msra.mxu1 %v2266_v29 }
 0x546   :  { %1998 = vmatprep.subr.bf16.mxu1 %v2357_v60 }
 0x549   :  { %1999 = vmatpush3.bf16.msra.mxu1 %v2267_v12 }
 0x54a   :  { %2000 = vmatprep.subr.bf16.mxu1 %v2357_v60 }
 0x54d   :  { %2001 = vmatpush3.bf16.msra.mxu1 %v2268_v47 }
 0x54e   :  { %2002 = vmatprep.subr.bf16.mxu1 %v2357_v60 }
 0x551   :  { %2003 = vmatpush3.bf16.msra.mxu1 %v2269_v48 }
 0x607   :  { %v1257_v51 = vpop.f32.mrb[16].mxu1 }
 0x608   :  { %1266 = vrot.lane.b32.xlu1 %v1257_v51, %s2351_s28  ;;  %v1986_v55 = vpop.f32.mrb[17].mxu1 }
 0x609   :  { %v1260_v56 = vpop.f32.mrb[18].mxu1  ;;  %v1352_v55 = vld [vmem:[%s2820_s3 + $0x2] ss:$0 sm:$0xff] }
 0x60a   :  { %1268 = vrot.lane.b32.xlu0 %v1260_v56, %s2351_s28  ;;  %v1987_v57 = vpop.f32.mrb[19].mxu1 }
 0x67a   :  { %v1267_v6 = vpop.permute.xlu1 %1266 }
 0x67b   :  { %v1272_v8 = vmax.f32 %v1257_v51, %v1267_v6  ;;  %v2273_v51 = vld [vmem:[#allocation2 + $0x1e8] sm:$0xff]  }
 0x67c   :  { %v1269_v0 = vpop.permute.xlu0 %1268 }
 0x67d   :  { %v1275_v11 = vrot.slane %v1272_v8, 1  ;;  %v1273_v14 = vmax.f32 %v1260_v56, %v1269_v0 }
 0x67f   :  { %v1277_v18 = vmax.f32 %v1272_v8, %v1275_v11  ;;  %v1293_v19 = vrot.slane %v1273_v14, 1 }
 0x681   :  { %v1295_v20 = vmax.f32 %v1273_v14, %v1293_v19  ;;  %v1279_v21 = vrot.slane %v1277_v18, 2  ;;  %v1285_v22 = vrot.slane %v1277_v18, 6  ;;  %v1283_v36 = vrot.slane %v1277_v18, 4 }
 0x683   :  { %v2153_v5 = vpack.i.bf16 %v1279_v21, %v1285_v22  ;;  %v1297_v24 = vrot.slane %v1295_v20, 2  ;;  %v1303_v25 = vrot.slane %v1295_v20, 6  ;;  %v1301_v7 = vrot.slane %v1295_v20, 4 }
 0x685   :  { %2154 = vrot.lane.b32.xlu1 %v2153_v5, %s2351_s28  ;;  %v2148_v27 = vpack.i.bf16 %v1297_v24, %v1303_v25 }
 0x687   :  { %2149 = vrot.lane.b32.xlu0 %v2148_v27, %s2351_s28 }
 0x6f7   :  { %v2155_v30 = vpop.permute.xlu1 %2154 }
 0x6f8   :  { %v2157_v32 = vunpack.i.h.bf16 %v2155_v30  ;;  %v2156_v33 = vunpack.i.l.bf16 %v2155_v30 }
 0x6f9   :  { %v2150_v31 = vpop.permute.xlu0 %2149 }
 0x6fa   :  { %v2152_v34 = vunpack.i.h.bf16 %v2150_v31  ;;  %v2151_v35 = vunpack.i.l.bf16 %v2150_v31  ;;  %v1290_v41 = vsel %vm1289_vm0, %v1277_v18, %v2157_v32  ;;  %v1291_v42 = vsel %vm1289_vm0, %v1283_v36, %v2156_v33 }
 0x6fc   :  { %v1307_v37 = vsel %vm1289_vm0, %v1295_v20, %v2152_v34  ;;  %v1308_v38 = vsel %vm1289_vm0, %v1301_v7, %v2151_v35 }
 0x6fd   :  { %v1311_v39 = vrot.slane %v1307_v37, 7  ;;  %v1312_v40 = vrot.slane %v1308_v38, 7 }
 0x6ff   :  { %v1317_v43 = vsel %vm1315_vm1, %v1291_v42, %v1312_v40  ;;  %v1316_v44 = vsel %vm1315_vm1, %v1290_v41, %v1311_v39 }
 0x700   :  { %v1351_v45 = vpack.c.bf16 %v1317_v43, %v1317_v43  ;;  %v1350_v46 = vpack.c.bf16 %v1316_v44, %v1316_v44 }
 0x702   :  { %1481 = vmatprep.mubr.bf16.mxu0 %v1351_v45 }
 0x703   :  { %1482 = vmatmul.mubr.bf16.vlgmr.msra.gmra.mrb[28].mxu0 %v1350_v46 }
 0x704   :  { %2024 = vmatprep.mubr.msk.bf16.mxu0 %vm2358_vm10, %v2357_v60  ;;  %2009 = vmatpush3.bf16.msra.mxu0 %v2270_v2 }
 0x705   :  { %2010 = vmatprep.subr.bf16.mxu0 %v2357_v60 }
 0x708   :  { %2011 = vmatpush3.bf16.msra.mxu0 %v2271_v49 }
 0x709   :  { %2012 = vmatprep.subr.bf16.mxu0 %v2357_v60 }
 0x70c   :  { %2013 = vmatpush3.bf16.msra.mxu0 %v2272_v50 }
 0x70d   :  { %2014 = vmatprep.subr.bf16.mxu0 %v2357_v60 }
 0x710   :  { %2015 = vmatpush3.bf16.msra.mxu0 %v2273_v51 }
 0x711   :  { %2016 = vmatprep.subr.bf16.mxu0 %v2357_v60 }
 0x714   :  { %2017 = vmatpush3.bf16.msra.mxu0 %v2274_v52 }
 0x715   :  { %2018 = vmatprep.subr.bf16.mxu0 %v2357_v60 }
 0x718   :  { %2019 = vmatpush3.bf16.msra.mxu0 %v2275_v53 }
 0x719   :  { %2020 = vmatprep.subr.bf16.mxu0 %v2357_v60 }
 0x71c   :  { %2021 = vmatpush3.bf16.msra.mxu0 %v2276_v62 }
 0x71d   :  { %2022 = vmatprep.subr.bf16.mxu0 %v2357_v60 }
 0x720   :  { %2023 = vmatpush3.bf16.msra.mxu0 %v2277_v63 }
 0x7d6   :  { %v1908_v54 = vpop.f32.mrb[28].mxu0 }
 0x7d7   :  { %v1909_v56 = vpop.f32.mrb[29].mxu0 }
 0x7d8   :  { %v1910_v57 = vadd.f32 %v1909_v56, %v1908_v54  ;;  %v1911_v58 = vpop.f32.mrb[30].mxu0 }
 0x7d9   :  { %v1912_v59 = vpop.f32.mrb[31].mxu0 }
 0x7da   :  { %v1484_v23 = vadd.f32 %v1910_v57, %v1352_v55 }
 0x7dc   :  { %v1489_v61 = vmax.f32 %v1484_v23, 0.0 }
 0x7de   :  { %v1506_v13 = vpack.c.bf16 %v1489_v61, %v1489_v61 }
 0x7e0   :  { %2005 = vmatmul.mubr.bf16.vlgmr.msra.gmra.mrb[20].mxu1 %v1506_v13 }
 0x8b3   :  { %v1590_v4 = vpop.f32.mrb[20].mxu1 }
 0x8b4   :  { %v1591_v6 = vadd.f32 %v1590_v4, %v1507_v3  ;;  %v2006_v1 = vpop.f32.mrb[21].mxu1 }
 0x8b5   :  { %v1593_v8 = vpop.f32.mrb[22].mxu1 }
 0x8b6   :  { %v1596_v9 = vmax.f32 %v1591_v6, 0.0  ;;  %v2007_v0 = vpop.f32.mrb[23].mxu1 }
 0x8b8   :  { %v1614_v11 = vpack.c.bf16 %v1596_v9, %v1596_v9  ;;  %1597 = vst [vmem:[#allocation6] sm:$0x3] %v1596_v9 }
 0x8ba   :  { %2025 = vmatmul.mubr.bf16.vlgmr.msra.gmra.mrb[32].mxu0 %v1614_v11 }
 0x8bb   :  { %2311 = shalt.err (!%p2308_p12)
}
 0x8bc   :  { %s2312_s2 = scalar_lea.hbm %s2822_s5, 32 }
 0x8bd   :  { %p2313_p13 = scmp.ne.s32.totalorder %s2822_s5, %s2312_s2  ;;  %p2316_p0 = scmp.lt.u32.totalorder %s2312_s2, %s2822_s5 }
 0x8bf   :  { %p2318_p1 = pnand %p2316_p0, %p2313_p13 }
 0x8c1   :  { %2321 = shalt.err (!%p2318_p1)
}
 0x8c2   :  { %1724 = dma.vmem_to_hbm [thread:$0]  %s1722_s8, 32, %s2822_s5, [#allocation7]   ;;  %v1615_v60 = vld [vmem:[%s2820_s3 + $0x4] ss:$0 sm:$0xff] }
 0x8c3   :  { %s2364_s21 = smov [#allocation5]  }
 0x8c4   :  { %s1711_s29 = sshll.u32 %s2364_s21, 4  ;;  %s1712_s29 = int_to_ptr.vmem [resolvable:$true] %s1711_s29 }
 0x8c5   :  { %s2322_s22 = scalar_lea.vmem %s1712_s29, 32  ;;  %p2327_p3 = scmp.lt.s32.totalorder %s1712_s29, %s1712_s29 }
 0x8c6   :  { %p2323_p2 = scmp.ne.s32.totalorder %s1712_s29, %s2322_s22  ;;  %p2328_p4 = scmp.lt.s32.totalorder %s2322_s22, %s2322_s22 }
 0x8c8   :  { %p2329_p5 = por %p2328_p4, %p2327_p3 }
 0x8ca   :  { %p2330_p6 = pnand %p2329_p5, %p2323_p2 }
 0x98d   :  { %v1698_v14 = vpop.f32.mrb[32].mxu0 }
 0x98e   :  { %v1699_v15 = vadd.f32 %v1698_v14, %v1615_v60  ;;  %v2026_v17 = vpop.f32.mrb[33].mxu0 }
 0x98f   :  { %v1701_v18 = vpop.f32.mrb[34].mxu0 }
 0x990   :  { %1704 = vst [vmem:[#allocation5] sm:$0x3] %v1699_v15  ;;  %v2027_v19 = vpop.f32.mrb[35].mxu0 }
 0x991   :  { %2333 = shalt.err (!%p2330_p6)
}
 0x992   :  { %s2334_s3 = scalar_lea.hbm %s2821_s4, 32 }
 0x993   :  { %p2335_p7 = scmp.ne.s32.totalorder %s2821_s4, %s2334_s3  ;;  %p2338_p8 = scmp.lt.u32.totalorder %s2334_s3, %s2821_s4 }
 0x995   :  { %p2340_p9 = pnand %p2338_p8, %p2335_p7 }
 0x997   :  { %2343 = shalt.err (!%p2340_p9)
}
 0x998   :  { %1714 = dma.vmem_to_hbm [thread:$0]  %s1712_s29, 32, %s2821_s4, [#allocation4]  }
 0x999   :  { %2346 = dma.done.wait [#allocation4], 32  }
 0x99a   :  { %2347 = vsyncadd [#allocation4], 4294967264 }
 0x99b   :  { %2348 = dma.done.wait [#allocation7], 32  }
 0x99c   :  { %2349 = vsyncadd [#allocation7], 4294967264 }
 0x99d   :  { %1731 = vsyncpa [#allocation3], 1 }
 0x99e   :  { %1732 = vsyncpa [#allocation4], 1 }
 0x99f   :  { %1733 = vsyncpa [#allocation7], 1 }

</bundles_post_ra>
